<compile_context>
chip_gen: v7x
topology: tpu7x:2x2x1
jax: 0.10.0
libtpu: 0.0.40
codegen_flags: <defaults>
</compile_context>

<pallas_src>
import math

import jax
import jax.numpy as jnp
from jax.experimental import pallas as pl
from jax.experimental.pallas import tpu as pltpu

_LANE = 128


def _logreg_kernel(x_ref, w_ref, b_ref, o_ref):
    # x_ref: (TB, D) VMEM tile (streamed); w_ref: (1, D) VMEM (resident);
    # b_ref: (1, 1) SMEM scalar; o_ref: (1, 1, TB) VMEM lane-dense output tile.
    x = x_ref[...]
    w = w_ref[...]

    # VPU elementwise multiply + XLU lane reduction (no MXU for an N=1 GEMV).
    if x.dtype == jnp.bfloat16:
        # bf16 multiply on the bf16-capable VPU (v6e/v7x), f32 accumulation.
        z = jnp.sum(x * w.astype(x.dtype), axis=-1, keepdims=True,
                    dtype=jnp.float32)                      # (TB, 1) f32
    else:
        z = jnp.sum(x.astype(jnp.float32) * w.astype(jnp.float32),
                    axis=-1, keepdims=True)                 # (TB, 1) f32

    z = z + b_ref[0, 0]                                     # scalar bias from SMEM
    y = jax.nn.sigmoid(z)                                   # EUP exp path

    # Relayout the column into a lane-dense row: full-lane unmasked vst since
    # TB is a multiple of 128.
    o_ref[...] = y.reshape(1, 1, -1).astype(o_ref.dtype)


def _round_up(n, m):
    return ((n + m - 1) // m) * m


def _vmem_capacity_bytes():
    try:
        info = pltpu.get_tpu_info()
        return int(getattr(info, "vmem_capacity_bytes", 64 << 20))
    except Exception:
        return 64 << 20  # conservative (v7x per-TC physical)


def _tile_target_bytes():
    # Bytes-per-x-tile target.  v7x (64 MiB VMEM but 3.2 TB/s HBM) needs the
    # LARGEST tiles to hide the fixed per-grid-step overhead; 2 x 8 MiB
    # double-buffered still fits comfortably.  v5e/v6e (128 MiB VMEM, slower
    # HBM) are already at roofline with ~4-6 MiB tiles.
    return (8 << 20) if _vmem_capacity_bytes() <= (64 << 20) else (6 << 20)


def _sublane_align(itemsize):
    # dtype-aware sublane packing: 8 (f32) / 16 (bf16) / 32 (int8/fp8).
    return 8 * max(1, 4 // max(int(itemsize), 1))


def _pick_batch_tile(batch, d, itemsize):
    row_bytes = max(1, d * int(itemsize))
    target = _tile_target_bytes()
    sub = _sublane_align(itemsize)
    # Lane alignment (128) keeps the lane-dense output store unmasked; fall
    # back to sublane alignment only when even 128 rows would blow the budget
    # (extremely wide D).
    align = _LANE if target // row_bytes >= _LANE else sub
    tb = max(align, (target // row_bytes) // align * align)
    tb = min(tb, _round_up(batch, align))
    # Guarantee >= 2 grid steps when the batch allows it so the "parallel"
    # batch axis lands work on both TensorCores on v7x (costs ~0.35us on
    # single-TC generations, negligible).
    if batch > align:
        tb = min(tb, _round_up(pl.cdiv(batch, 2), align))
    return max(align, tb)


def logistic_regression(x, weight, bias, *, block_b=None):
    """sigmoid(x @ weight.T + bias). x: (B, D), weight: (1, D), bias: (1,) -> (B, 1)."""
    B, D = x.shape
    itemsize = int(x.dtype.itemsize)

    if block_b is None:
        tb = _pick_batch_tile(B, D, itemsize)
    else:
        align = _LANE if block_b >= _LANE else _sublane_align(itemsize)
        tb = max(align, (block_b // align) * align)

    n_tiles = pl.cdiv(B, tb)  # no jnp.pad: the last block over-reads, tail rows
    #                           are independent and sliced off below.

    bias_smem = bias.reshape(1, 1).astype(jnp.float32)

    # VMEM budget actually used (double-buffered x tiles + out tiles + weight),
    # passed explicitly so the tile choice is never pinned to the scoped default.
    w_bytes = D * int(weight.dtype.itemsize)
    x_tile_bytes = tb * D * itemsize
    out_tile_bytes = tb * itemsize
    vmem_needed = 2 * x_tile_bytes + 2 * out_tile_bytes + 2 * w_bytes + (2 << 20)
    vmem_limit = int(min(max(32 << 20, vmem_needed),
                         max(32 << 20, _vmem_capacity_bytes() - (4 << 20))))

    cost = pl.CostEstimate(
        flops=2 * B * D,
        transcendentals=B,
        bytes_accessed=B * D * itemsize + w_bytes + n_tiles * tb * itemsize,
    )

    out_tiles = pl.pallas_call(
        _logreg_kernel,
        out_shape=jax.ShapeDtypeStruct((n_tiles, 1, tb), x.dtype),
        grid=(n_tiles,),
        in_specs=[
            pl.BlockSpec((tb, D), lambda i: (i, 0)),                # stream x tiles
            pl.BlockSpec((1, D), lambda i: (0, 0)),                 # weight VMEM-resident
            pl.BlockSpec(memory_space=pltpu.MemorySpace.SMEM),      # bias scalar in SMEM
        ],
        out_specs=pl.BlockSpec((1, 1, tb), lambda i: (i, 0, 0)),    # lane-dense output tile
        compiler_params=pltpu.CompilerParams(
            dimension_semantics=("parallel",),                      # shard batch over TCs (v7x)
            vmem_limit_bytes=vmem_limit,
        ),
        cost_estimate=cost,
    )(x, weight, bias_smem)

    # (n_tiles, 1, TB) row-major == batch order; back to PyTorch's (B, 1).
    return out_tiles.reshape(n_tiles * tb, 1)[:B]


def init_params(key, input_size):
    # Xavier (Glorot) uniform for weight of shape (1, input_size), bias = 0.
    fan_in, fan_out = input_size, 1
    bound = math.sqrt(6.0 / (fan_in + fan_out))
    weight = jax.random.uniform(
        key, (1, input_size), minval=-bound, maxval=bound, dtype=jnp.float32
    )
    bias = jnp.zeros((1,), dtype=jnp.float32)
    return weight, bias


if __name__ == "__main__":
    input_size = 32
    batch = 300          # not a multiple of the tile -> exercises the pad-free ragged tail

    key = jax.random.PRNGKey(0)
    k_w, k_x = jax.random.split(key)

    weight, bias = init_params(k_w, input_size)
    x = jax.random.normal(k_x, (batch, input_size), dtype=jnp.float32)

    # Reference (same math as the PyTorch module).
    ref = jax.nn.sigmoid(x @ weight.T + bias)

    # Auto tile sizing (bytes-based, generation-aware, >=2 grid steps).
    out_auto = jax.block_until_ready(logistic_regression(x, weight, bias))
    # Explicit small tile -> multi-step grid with a partial (over-read) tail block.
    out_tiled = jax.block_until_ready(logistic_regression(x, weight, bias, block_b=128))

    assert out_auto.shape == (batch, 1)
    assert out_tiled.shape == (batch, 1)
    assert jnp.allclose(out_auto, ref, atol=1e-5, rtol=1e-5)
    assert jnp.allclose(out_tiled, ref, atol=1e-5, rtol=1e-5)

    print("KERNEL_OK")
</pallas_src>

<mosaic_0001>
module attributes {stable_mosaic.version = 11 : i64} {
  func.func @_logreg_kernel(%arg0: i32, %arg1: memref<256x32xf32, #tpu.memory_space<vmem>>, %arg2: memref<1x32xf32, #tpu.memory_space<vmem>>, %arg3: memref<1x1xf32, #tpu.memory_space<smem>>, %arg4: memref<1x1x256xf32, #tpu.memory_space<vmem>>) attributes {dimension_semantics = [#tpu.dimension_semantics<parallel>], iteration_bounds = array<i64: 2>, scalar_prefetch = 0 : i64, scratch_operands = 0 : i64, tpu.core_type = #tpu.core_type<tc>, window_params = [{transform_indices = @transform_0, window_bounds = array<i64: 256, 32>}, {pipeline_mode = #tpu.pipeline_mode<synchronous>, transform_indices = @transform_1, window_bounds = array<i64: 1, 32>}, {transform_indices = @transform_2, window_bounds = array<i64: 1, 1>}, {transform_indices = @transform_3, window_bounds = array<i64: 1, 1, 256>}]} {
    %c0 = arith.constant 0 : index
    %c0_0 = arith.constant 0 : index
    %0 = vector.load %arg1[%c0, %c0_0] : memref<256x32xf32, #tpu.memory_space<vmem>>, vector<256x32xf32>
    %c0_1 = arith.constant 0 : index
    %c0_2 = arith.constant 0 : index
    %1 = vector.load %arg2[%c0_1, %c0_2] : memref<1x32xf32, #tpu.memory_space<vmem>>, vector<1x32xf32>
    %2 = vector.broadcast %1 : vector<1x32xf32> to vector<256x32xf32>
    %3 = arith.mulf %0, %2 : vector<256x32xf32>
    %cst = arith.constant dense<0.000000e+00> : vector<256xf32>
    %4 = vector.multi_reduction <add>, %3, %cst [1] : vector<256x32xf32> to vector<256xf32>
    %5 = vector.shape_cast %4 : vector<256xf32> to vector<256x1xf32>
    %c0_3 = arith.constant 0 : index
    %c0_4 = arith.constant 0 : index
    %6 = memref.load %arg3[%c0_3, %c0_4] : memref<1x1xf32, #tpu.memory_space<smem>>
    %7 = vector.broadcast %6 : f32 to vector<256x1xf32>
    %8 = arith.addf %5, %7 : vector<256x1xf32>
    %9 = arith.negf %8 : vector<256x1xf32>
    %10 = math.exp %9 : vector<256x1xf32>
    %cst_5 = arith.constant 1.000000e+00 : f32
    %11 = vector.broadcast %cst_5 : f32 to vector<256x1xf32>
    %12 = arith.addf %11, %10 : vector<256x1xf32>
    %13 = arith.divf %11, %12 : vector<256x1xf32>
    %14 = vector.shape_cast %13 : vector<256x1xf32> to vector<1x1x256xf32>
    %c0_6 = arith.constant 0 : index
    %c0_7 = arith.constant 0 : index
    %c0_8 = arith.constant 0 : index
    %15 = vector.load %arg4[%c0_6, %c0_7, %c0_8] : memref<1x1x256xf32, #tpu.memory_space<vmem>>, vector<1x1x256xf32>
    tpu.vector_store %arg4[%c0_6, %c0_7, %c0_8], %14 {strides = array<i32>} : memref<1x1x256xf32, #tpu.memory_space<vmem>>, vector<1x1x256xf32>,
    return
  }
  func.func @transform_0(%arg0: i32) -> (i32, i32) {
    %c0_i32 = arith.constant 0 : i32
    %c0_i32_0 = arith.constant 0 : i32
    return %arg0, %c0_i32 : i32, i32
  }
  func.func @transform_1(%arg0: i32) -> (i32, i32) {
    %c0_i32 = arith.constant 0 : i32
    %c0_i32_0 = arith.constant 0 : i32
    %c0_i32_1 = arith.constant 0 : i32
    return %c0_i32, %c0_i32_0 : i32, i32
  }
  func.func @transform_2(%arg0: i32) -> (i32, i32) {
    %c0_i32 = arith.constant 0 : i32
    %c0_i32_0 = arith.constant 0 : i32
    %c0_i32_1 = arith.constant 0 : i32
    return %c0_i32, %c0_i32_0 : i32, i32
  }
  func.func @transform_3(%arg0: i32) -> (i32, i32, i32) {
    %c0_i32 = arith.constant 0 : i32
    %c0_i32_0 = arith.constant 0 : i32
    %c0_i32_1 = arith.constant 0 : i32
    return %arg0, %c0_i32, %c0_i32_0 : i32, i32, i32
  }
}

</mosaic_0001>

<bundles_post_ra>
// kernel: tpu_custom_call.1
= control target key start
LH: loop header
LB: loop body
LE: loop exit
PB: predicated region body
PF: predicated region fallthrough
CT: control target
= control target key end

     0   :  { %s5037_s0 = inlined_call_operand.vmem [shape: f32[300,32], index: 0, kind: input, shape index: {}]   ;;  %s5038_s1 = inlined_call_operand.vmem [shape: f32[1,32], index: 1, kind: input, shape index: {}]   ;;  %s5039_s2 = inlined_call_operand.<no memory space> [shape: f32[1,1], index: 2, kind: input, shape index: {}]   ;;  %s5040_s3 = inlined_call_operand.hbm [shape: f32[2,1,256], index: 3, kind: output, shape index: {}]  }
   0x1   :  { %8 = sst [smem:[#allocation2]] %s5039_s2 }
   0x2   :  { %9 = vsyncpa [#allocation4], 0 }
   0x3   :  { %11 = vsyncpa [#allocation4 + $0x1], 0  ;;  %s3898_s14 = smov 0   ;;  %s3900_s15 = smov 0  }
   0x4   :  { %s3902_s16 = smov 0   ;;  %s3904_s17 = smov 0  }
   0x5 LB: > { %s3590_s2 = sadd.s32 4294967295, %s3870_s17   ;;  %s3591_s18 = sadd.s32 4294967294, %s3870_s17   ;;  %s3870_s17 = sphi %s3904_s17, %s5046_s17   ;;  %s3866_s16 = sphi %s3902_s16, %s5045_s16   ;;  %s3862_s15 = sphi %s3900_s15, %s5044_s15   ;;  %s3858_s14 = sphi %s3898_s14, %s5043_s14  }
   0x6   : > { %s3921_s19 = sadd.s32 1, %s3870_s17   ;;  %s92_s20 = sadd.s32 1, %s3866_s16 }
   0x7   : > { %s89_s21 = ssub.s32 %s3870_s17, %s3921_s19  ;;  %p102_p0 = scmp.ne.s32.totalorder %s3866_s16, %s3862_s15 }
   0x8   : > { %p90_p1 = scmp.eq.s32.totalorder %s89_s21, 0  ;;  %p103_p2 = scmp.eq.s32.totalorder %s3590_s2, 1 }
   0x9   : > { %p108_p3 = scmp.ne.s32.totalorder %s3862_s15, %s3858_s14  ;;  %p109_p4 = scmp.eq.s32.totalorder %s3591_s18, 1 }
   0xa   : > { %s3931_s22 = scalar_select %p90_p1, %s3866_s16, %s92_s20  }
   0xb   : > { %p3933_p5 = por %p103_p2, %p102_p0  ;;  %p3937_p6 = por %p109_p4, %p108_p3 }
   0xc   : > { %p3594_p7 = scmp.ge.s32.totalorder %s3870_s17, 1  ;;  %p150_p8 = scmp.lt.s32.totalorder %s3870_s17, 3 }
   0xe   : > { %p151_p9 = pnand %p3594_p7, %p150_p8 }
   0xf   : > { %s3943_s25 = sshll.u32 (!%p151_p9), %s3590_s2, 5  ;;  %v3950_v0 = vld [vmem:[%s5038_s1] ss:$0 sm:$0xff] (!%p151_p9)  ;;  %vm263_vm0 = vcmask (!%p151_p9), 261120   ;;  %s360_s6 = sld [smem:[#allocation2]] (!%p151_p9)  ;;  %vm3317_vm1 = vcmask (!%p151_p9), 130112  }
  0x10   : > { %154 = sbr.rel (%p151_p9) target bundleno = 554 (0x22a), region = 32  ;;  %p183_p10 = scmp.lt.s32.totalorder (!%p151_p9), %s3943_s25, 37  ;;  %vm3324_vm2 = vcmask (!%p151_p9), 195712   ;;  %vm3331_vm3 = vcmask (!%p151_p9), 261312   ;;  %vm3338_vm4 = vcmask (!%p151_p9), 326912   ;;  %vm3345_vm5 = vcmask (!%p151_p9), 392512  }
  0x11   : > { %vm3352_vm6 = vcmask (!%p151_p9), 458112   ;;  %vm3359_vm7 = vcmask (!%p151_p9), 523712   ;;  %vm3366_vm8 = vcmask (!%p151_p9), 589312   ;;  %vm3373_vm9 = vcmask (!%p151_p9), 654912   ;;  %s175_s7 = sand.u32 (!%p151_p9), 1, %s3862_s15   ;;  %s4993_s13 = scalar_lea.hbm (!%p151_p9), %s5040_s3, %s3943_s25 }
  0x12   : > { %vm3380_vm10 = vcmask (!%p151_p9), 720512   ;;  %vm3387_vm11 = vcmask (!%p151_p9), 786112   ;;  %vm3394_vm12 = vcmask (!%p151_p9), 851712   ;;  %vm3401_vm13 = vcmask (!%p151_p9), 917312   ;;  %s3595_s8 = sshll.u32 (!%p151_p9), %s175_s7, 1  ;;  %s3518_s2 = scalar_lea.sflag (!%p151_p9), [#allocation4], %s175_s7 }
  0x13   : > { %vm3408_vm14 = vcmask (!%p151_p9), 982912   ;;  %vm3415_vm15 = vcmask (!%p151_p9), 1048512   ;;  %s177_s9 = scalar_lea.vmem (!%p151_p9), [#allocation3], %s3595_s8  ;;  %s3874_s20 = smov (!%p151_p9), [#allocation3]  }
  0x14   : > { %s3532_s10 = sshll.u32 (!%p151_p9), %s177_s9, 4  ;;  %s3812_s21 = sshll.u32 (!%p151_p9), %s3874_s20, 4  ;;  %s4995_s10 = int_to_ptr.vmem [resolvable:$true] %s3532_s10  ;;  %s3813_s21 = int_to_ptr.vmem [resolvable:$false] %s3812_s21 }
  0x15   : > { %s3808_s18 = scalar_lea.vmem (!%p151_p9), %s4995_s10, 32  ;;  %p3815_p0 = scmp.lt.s32.totalorder (!%p151_p9), %s4995_s10, %s3813_s21 }
  0x16   : > { %p3809_p11 = scmp.ne.s32.totalorder (!%p151_p9), %s4995_s10, %s3808_s18 }
  0x17   : > { %s184_s26 = scalar_select %p183_p10, %s3943_s25, 37 }
  0x18   : > { %p3810_p12 = pnand %p3809_p11, %p3933_p5 }
  0x19   : > { %s3597_s27 = sshll.u32 %s184_s26, 3  ;;  %s3814_s26 = scalar_lea.vmem %s3813_s21, 64 }
  0x1a   : > { %s3955_s5 = scalar_lea.vmem %s5037_s0, %s3597_s27  ;;  %p3811_p13 = pneg %p3810_p12 }
  0x1b   : > { %v192_v1 = vld [vmem:[%s3955_s5] sm:$0xff]  ;;  %v193_v2 = vld [vmem:[%s3955_s5 + $0x8] sm:$0xff]  ;;  %v194_v3 = vld [vmem:[%s3955_s5 + $0x10] sm:$0xff]  ;;  %p3816_p1 = scmp.lt.s32.totalorder %s3814_s26, %s3808_s18 }
  0x1c   : > { %v231_v4 = vmul.f32 %v3950_v0, %v192_v1  ;;  %v232_v5 = vmul.f32 %v3950_v0, %v193_v2  ;;  %v233_v6 = vmul.f32 %v3950_v0, %v194_v3  ;;  %v195_v7 = vld [vmem:[%s3955_s5 + $0x18] sm:$0xff]  ;;  %v196_v8 = vld [vmem:[%s3955_s5 + $0x20] sm:$0xff]  ;;  %v209_v17 = vld [vmem:[%s3955_s5 + $0x88] sm:$0xff] }
  0x1d   : > { %v234_v9 = vmul.f32 %v3950_v0, %v195_v7  ;;  %v208_v12 = vld [vmem:[%s3955_s5 + $0x80] sm:$0xff]  ;;  %v235_v14 = vmul.f32 %v3950_v0, %v196_v8  ;;  %v210_v18 = vld [vmem:[%s3955_s5 + $0x90] sm:$0xff]  ;;  %v248_v20 = vmul.f32 %v3950_v0, %v209_v17  ;;  %v211_v23 = vld [vmem:[%s3955_s5 + $0x98] sm:$0xff]  ;;  %p3817_p2 = por %p3816_p1, %p3815_p0 }
  0x1e   : > { %v264_v10 = vsel %vm263_vm0, %v231_v4, 0.0  ;;  %v270_v11 = vsel %vm263_vm0, %v233_v6, 0.0  ;;  %v267_v13 = vsel %vm263_vm0, %v232_v5, 0.0  ;;  %v247_v16 = vmul.f32 %v3950_v0, %v208_v12  ;;  %v212_v24 = vld [vmem:[%s3955_s5 + $0xa0] sm:$0xff]  ;;  %v197_v29 = vld [vmem:[%s3955_s5 + $0x28] sm:$0xff]  ;;  %v198_v35 = vld [vmem:[%s3955_s5 + $0x30] sm:$0xff] }
  0x1f   : > { %265 = vadd.xlane.f32.xlu0 %v264_v10  ;;  %271 = vadd.xlane.f32.xlu1 %v270_v11  ;;  %v273_v15 = vsel %vm263_vm0, %v234_v9, 0.0  ;;  %v276_v19 = vsel %vm263_vm0, %v235_v14, 0.0  ;;  %v249_v22 = vmul.f32 %v3950_v0, %v210_v18  ;;  %v315_v25 = vsel %vm263_vm0, %v248_v20, 0.0  ;;  %v213_v30 = vld [vmem:[%s3955_s5 + $0xa8] sm:$0xff]  ;;  %v214_v36 = vld [vmem:[%s3955_s5 + $0xb0] sm:$0xff]  ;;  %v199_v41 = vld [vmem:[%s3955_s5 + $0x38] sm:$0xff]  ;;  %p3818_p3 = pnand %p3817_p2, %p3811_p13 }
  0x20   : > { %v312_v21 = vsel %vm263_vm0, %v247_v16, 0.0  ;;  %v250_v26 = vmul.f32 %v3950_v0, %v211_v23  ;;  %v251_v28 = vmul.f32 %v3950_v0, %v212_v24  ;;  %v236_v32 = vmul.f32 %v3950_v0, %v197_v29  ;;  %v215_v42 = vld [vmem:[%s3955_s5 + $0xb8] sm:$0xff]  ;;  %v200_v47 = vld [vmem:[%s3955_s5 + $0x40] sm:$0xff]  ;;  %v201_v53 = vld [vmem:[%s3955_s5 + $0x48] sm:$0xff] }
  0x21   : > { %v318_v27 = vsel %vm263_vm0, %v249_v22, 0.0  ;;  %v252_v34 = vmul.f32 %v3950_v0, %v213_v30  ;;  %v237_v38 = vmul.f32 %v3950_v0, %v198_v35  ;;  %v253_v40 = vmul.f32 %v3950_v0, %v214_v36  ;;  %v216_v48 = vld [vmem:[%s3955_s5 + $0xc0] sm:$0xff]  ;;  %v217_v54 = vld [vmem:[%s3955_s5 + $0xc8] sm:$0xff]  ;;  %v202_v59 = vld [vmem:[%s3955_s5 + $0x50] sm:$0xff] }
  0x22   : > { %v321_v31 = vsel %vm263_vm0, %v250_v26, 0.0  ;;  %v324_v33 = vsel %vm263_vm0, %v251_v28, 0.0  ;;  %v279_v37 = vsel %vm263_vm0, %v236_v32, 0.0  ;;  %v238_v44 = vmul.f32 %v3950_v0, %v199_v41  ;;  %v218_v60 = vld [vmem:[%s3955_s5 + $0xd0] sm:$0xff]  ;;  %v203_v2 = vld [vmem:[%s3955_s5 + $0x58] sm:$0xff]  ;;  %v204_v8 = vld [vmem:[%s3955_s5 + $0x60] sm:$0xff] }
  0x23   : > { %268 = vadd.xlane.f32.xlu0 %v267_v13  ;;  %274 = vadd.xlane.f32.xlu1 %v273_v15  ;;  %v327_v39 = vsel %vm263_vm0, %v252_v34, 0.0  ;;  %v282_v43 = vsel %vm263_vm0, %v237_v38, 0.0  ;;  %v330_v45 = vsel %vm263_vm0, %v253_v40, 0.0  ;;  %v254_v46 = vmul.f32 %v3950_v0, %v215_v42  ;;  %v219_v3 = vld [vmem:[%s3955_s5 + $0xd8] sm:$0xff]  ;;  %v220_v9 = vld [vmem:[%s3955_s5 + $0xe0] sm:$0xff]  ;;  %v205_v14 = vld [vmem:[%s3955_s5 + $0x68] sm:$0xff] }
  0x24   : > { %v285_v49 = vsel %vm263_vm0, %v238_v44, 0.0  ;;  %v239_v50 = vmul.f32 %v3950_v0, %v200_v47  ;;  %v255_v52 = vmul.f32 %v3950_v0, %v216_v48  ;;  %v240_v56 = vmul.f32 %v3950_v0, %v201_v53  ;;  %v221_v15 = vld [vmem:[%s3955_s5 + $0xe8] sm:$0xff]  ;;  %v206_v20 = vld [vmem:[%s3955_s5 + $0x70] sm:$0xff]  ;;  %v207_v26 = vld [vmem:[%s3955_s5 + $0x78] sm:$0xff] }
  0x25   : > { %v333_v51 = vsel %vm263_vm0, %v254_v46, 0.0  ;;  %v256_v58 = vmul.f32 %v3950_v0, %v217_v54  ;;  %v241_v63 = vmul.f32 %v3950_v0, %v202_v59  ;;  %v257_v1 = vmul.f32 %v3950_v0, %v218_v60 }
  0x26   : > { %v288_v55 = vsel %vm263_vm0, %v239_v50, 0.0  ;;  %v336_v57 = vsel %vm263_vm0, %v255_v52, 0.0  ;;  %v291_v61 = vsel %vm263_vm0, %v240_v56, 0.0  ;;  %v242_v6 = vmul.f32 %v3950_v0, %v203_v2 }
  0x27   : > { %277 = vadd.xlane.f32.xlu0 %v276_v19  ;;  %313 = vadd.xlane.f32.xlu1 %v312_v21  ;;  %v339_v62 = vsel %vm263_vm0, %v256_v58, 0.0  ;;  %v294_v4 = vsel %vm263_vm0, %v241_v63, 0.0  ;;  %v342_v5 = vsel %vm263_vm0, %v257_v1, 0.0  ;;  %v258_v7 = vmul.f32 %v3950_v0, %v219_v3  ;;  %v222_v21 = vld [vmem:[%s3955_s5 + $0xf0] sm:$0xff] }
  0x28   : > { %v297_v10 = vsel %vm263_vm0, %v242_v6, 0.0  ;;  %v243_v12 = vmul.f32 %v3950_v0, %v204_v8  ;;  %v259_v13 = vmul.f32 %v3950_v0, %v220_v9  ;;  %v244_v18 = vmul.f32 %v3950_v0, %v205_v14 }
  0x29   : > { %v345_v11 = vsel %vm263_vm0, %v258_v7, 0.0  ;;  %v260_v19 = vmul.f32 %v3950_v0, %v221_v15  ;;  %v245_v24 = vmul.f32 %v3950_v0, %v206_v20  ;;  %v246_v30 = vmul.f32 %v3950_v0, %v207_v26 }
  0x2a   : > { %v300_v16 = vsel %vm263_vm0, %v243_v12, 0.0  ;;  %v348_v17 = vsel %vm263_vm0, %v259_v13, 0.0  ;;  %v303_v22 = vsel %vm263_vm0, %v244_v18, 0.0  ;;  %v3872_v32 = vmov 0  }
  0x2b   : > { %316 = vadd.xlane.f32.xlu0 %v315_v25  ;;  %319 = vadd.xlane.f32.xlu1 %v318_v27  ;;  %v351_v23 = vsel %vm263_vm0, %v260_v19, 0.0  ;;  %v261_v25 = vmul.f32 %v3950_v0, %v222_v21  ;;  %v223_v27 = vld [vmem:[%s3955_s5 + $0xf8] sm:$0xff]  ;;  %v306_v28 = vsel %vm263_vm0, %v245_v24, 0.0  ;;  %v4053_v35 = vstv %s360_s6 }
  0x2c   : > { %3678 = vset.pattern.permute.xlu0 %v3872_v32  ;;  %3679 = vset.pattern.permute.xlu1 %v3872_v32  ;;  %v3873_v13 = vmov 1966171168  }
  0x2d   : > { %v354_v29 = vsel %vm263_vm0, %v261_v25, 0.0  ;;  %v1647_v14 = vunpack.c.l.s4 %v3873_v13 }
  0x2f   : > { %322 = vadd.xlane.f32.xlu0 %v321_v31  ;;  %325 = vadd.xlane.f32.xlu1 %v324_v33  ;;  %v262_v31 = vmul.f32 %v3950_v0, %v223_v27  ;;  %v309_v33 = vsel %vm263_vm0, %v246_v30, 0.0  ;;  %v1648_v27 = vunpack.c.0.s8 %v1647_v14 }
  0x31   : > { %v357_v34 = vsel %vm263_vm0, %v262_v31, 0.0 }
  0x33   : > { %280 = vadd.xlane.f32.xlu0 %v279_v37  ;;  %328 = vadd.xlane.f32.xlu1 %v327_v39 }
  0x37   : > { %283 = vadd.xlane.f32.xlu0 %v282_v43  ;;  %331 = vadd.xlane.f32.xlu1 %v330_v45 }
  0x3b   : > { %286 = vadd.xlane.f32.xlu0 %v285_v49  ;;  %334 = vadd.xlane.f32.xlu1 %v333_v51 }
  0x3f   : > { %289 = vadd.xlane.f32.xlu0 %v288_v55  ;;  %337 = vadd.xlane.f32.xlu1 %v336_v57  ;;  %v618_v57 = vlaneseq }
  0x41   : > { %vm3514_vm0 = vcmp.lt.s32.totalorder %v618_v57, 256 }
  0x43   : > { %292 = vadd.xlane.f32.xlu0 %v291_v61  ;;  %340 = vadd.xlane.f32.xlu1 %v339_v62 }
  0x47   : > { %295 = vadd.xlane.f32.xlu0 %v294_v4  ;;  %343 = vadd.xlane.f32.xlu1 %v342_v5  ;;  %v4066_v5 = vshrl.u32 %v618_v57, 7 }
  0x49   : > { %v4071_v18 = vsub.s32 0, %v4066_v5  ;;  %v4074_v21 = vsub.s32 1, %v4066_v5  ;;  %v4082_v32 = vsub.s32 3, %v4066_v5 }
  0x4b   : > { %298 = vadd.xlane.f32.xlu0 %v297_v10  ;;  %346 = vadd.xlane.f32.xlu1 %v345_v11 }
  0x4f   : > { %301 = vadd.xlane.f32.xlu0 %v300_v16  ;;  %349 = vadd.xlane.f32.xlu1 %v348_v17 }
  0x53   : > { %304 = vadd.xlane.f32.xlu0 %v303_v22  ;;  %352 = vadd.xlane.f32.xlu1 %v351_v23  ;;  %v4077_v22 = vsub.s32 2, %v4066_v5 }
  0x57   : > { %307 = vadd.xlane.f32.xlu0 %v306_v28  ;;  %355 = vadd.xlane.f32.xlu1 %v354_v29 }
  0x5b   : > { %310 = vadd.xlane.f32.xlu0 %v309_v33  ;;  %358 = vadd.xlane.f32.xlu1 %v357_v34  ;;  %v4085_v33 = vsub.s32 4, %v4066_v5  ;;  %v4088_v34 = vsub.s32 5, %v4066_v5 }
  0xac   : > { %v266_v36 = vpop.xlane.xlu0 %265  ;;  %v272_v37 = vpop.xlane.xlu1 %271 }
  0xad   : > { %v362_v38 = vadd.f32 %v4053_v35, %v266_v36  ;;  %v364_v0 = vadd.f32 %v4053_v35, %v272_v37 }
  0xaf   : > { %v3599_v39 = vmul.f32 -1.442695, %v362_v38  ;;  %v3601_v40 = vmul.f32 -1.442695, %v364_v0  ;;  %v4091_v38 = vsub.s32 6, %v4066_v5  ;;  %v4094_v0 = vsub.s32 7, %v4066_v5 }
  0xb0   : > { %v269_v41 = vpop.xlane.xlu0 %268  ;;  %v275_v42 = vpop.xlane.xlu1 %274 }
  0xb1   : > { %3680 = vpow2.f32 %v3599_v39  ;;  %v363_v43 = vadd.f32 %v4053_v35, %v269_v41  ;;  %v365_v44 = vadd.f32 %v4053_v35, %v275_v42  ;;  %v4097_v42 = vsub.s32 %v1648_v27, %v4066_v5 }
  0xb2   : > { %3682 = vpow2.f32 %v3601_v40 }
  0xb3   : > { %v3600_v45 = vmul.f32 -1.442695, %v363_v43  ;;  %v3602_v46 = vmul.f32 -1.442695, %v365_v44 }
  0xb4   : > { %v278_v47 = vpop.xlane.xlu0 %277  ;;  %v314_v48 = vpop.xlane.xlu1 %313 }
  0xb5   : > { %3684 = vpow2.f32 %v3600_v45  ;;  %v366_v49 = vadd.f32 %v4053_v35, %v278_v47  ;;  %v378_v50 = vadd.f32 %v4053_v35, %v314_v48 }
  0xb6   : > { %3686 = vpow2.f32 %v3602_v46 }
  0xb7   : > { %v3603_v51 = vmul.f32 -1.442695, %v366_v49  ;;  %v3615_v52 = vmul.f32 -1.442695, %v378_v50 }
  0xb8   : > { %v317_v53 = vpop.xlane.xlu0 %316  ;;  %v320_v54 = vpop.xlane.xlu1 %319 }
  0xb9   : > { %3688 = vpow2.f32 %v3603_v51  ;;  %v379_v55 = vadd.f32 %v4053_v35, %v317_v53  ;;  %v380_v56 = vadd.f32 %v4053_v35, %v320_v54 }
  0xba   : > { %3690 = vpow2.f32 %v3615_v52 }
  0xbb   : > { %v3681_v58 = vpop.eup %3680  ;;  %v3616_v59 = vmul.f32 -1.442695, %v379_v55  ;;  %v3617_v63 = vmul.f32 -1.442695, %v380_v56 }
  0xbc   : > { %v3683_v60 = vpop.eup %3682  ;;  %v490_v61 = vadd.f32 1.0, %v3681_v58  ;;  %v323_v62 = vpop.xlane.xlu0 %322 }
  0xbd   : > { %v326_v1 = vpop.xlane.xlu1 %325  ;;  %v492_v2 = vadd.f32 1.0, %v3683_v60  ;;  %3692 = vpow2.f32 %v3616_v59  ;;  %v381_v3 = vadd.f32 %v4053_v35, %v323_v62 }
  0xbe   : > { %v382_v4 = vadd.f32 %v4053_v35, %v326_v1  ;;  %3694 = vrcp.f32 %v490_v61 }
  0xbf   : > { %v3685_v6 = vpop.eup %3684  ;;  %3696 = vrcp.f32 %v492_v2  ;;  %v3618_v7 = vmul.f32 -1.442695, %v381_v3 }
  0xc0   : > { %v3687_v8 = vpop.eup %3686  ;;  %v491_v9 = vadd.f32 1.0, %v3685_v6  ;;  %v281_v10 = vpop.xlane.xlu0 %280  ;;  %3698 = vpow2.f32 %v3617_v63  ;;  %v3619_v11 = vmul.f32 -1.442695, %v382_v4 }
  0xc1   : > { %v329_v12 = vpop.xlane.xlu1 %328  ;;  %v493_v15 = vadd.f32 1.0, %v3687_v8  ;;  %3700 = vpow2.f32 %v3618_v7  ;;  %v367_v16 = vadd.f32 %v4053_v35, %v281_v10 }
  0xc2   : > { %v383_v17 = vadd.f32 %v4053_v35, %v329_v12  ;;  %3702 = vrcp.f32 %v491_v9 }
  0xc3   : > { %v3689_v19 = vpop.eup %3688  ;;  %3704 = vrcp.f32 %v493_v15  ;;  %v3604_v20 = vmul.f32 -1.442695, %v367_v16 }
  0xc4   : > { %v3691_v23 = vpop.eup %3690  ;;  %v494_v24 = vadd.f32 1.0, %v3689_v19  ;;  %v284_v25 = vpop.xlane.xlu0 %283  ;;  %3706 = vpow2.f32 %v3619_v11  ;;  %v3620_v26 = vmul.f32 -1.442695, %v383_v17 }
  0xc5   : > { %v332_v28 = vpop.xlane.xlu1 %331  ;;  %3708 = vpow2.f32 %v3604_v20  ;;  %v368_v29 = vadd.f32 %v4053_v35, %v284_v25  ;;  %v506_v30 = vadd.f32 1.0, %v3691_v23 }
  0xc6   : > { %v384_v31 = vadd.f32 %v4053_v35, %v332_v28  ;;  %3710 = vrcp.f32 %v494_v24 }
  0xc7   : > { %v3693_v36 = vpop.eup %3692  ;;  %v3605_v37 = vmul.f32 -1.442695, %v368_v29  ;;  %3712 = vrcp.f32 %v506_v30 }
  0xc8   : > { %v3695_v39 = vpop.eup %3694  ;;  %v507_v40 = vadd.f32 1.0, %v3693_v36  ;;  %v287_v41 = vpop.xlane.xlu0 %286  ;;  %3714 = vpow2.f32 %v3620_v26  ;;  %v3621_v43 = vmul.f32 -1.442695, %v384_v31 }
  0xc9   : > { %v4099_v44 = vpop.eup %3696  ;;  %3716 = vpow2.f32 %v3605_v37  ;;  %v369_v45 = vadd.f32 %v4053_v35, %v287_v41  ;;  %v621_v46 = vrot.slane %v3695_v39, %v4071_v18  ;;  %v625_v47 = vrot.slane %v3695_v39, %v4074_v21 }
  0xca   : > { %v3699_v48 = vpop.eup %3698  ;;  %3718 = vrcp.f32 %v507_v40  ;;  %v629_v49 = vrot.slane %v3695_v39, %v4077_v22  ;;  %v633_v50 = vrot.slane %v3695_v39, %v4082_v32  ;;  %v637_v51 = vrot.slane %v3695_v39, %v4085_v33 }
  0xcb   : > { %v3701_v52 = vpop.eup %3700  ;;  %v3606_v53 = vmul.f32 -1.442695, %v369_v45  ;;  %v508_v54 = vadd.f32 1.0, %v3699_v48  ;;  %v641_v55 = vrot.slane %v3695_v39, %v4088_v34  ;;  %v645_v56 = vrot.slane %v3695_v39, %v4091_v38 }
  0xcc   : > { %v3703_v58 = vpop.eup %3702  ;;  %v509_v59 = vadd.f32 1.0, %v3701_v52  ;;  %v290_v60 = vpop.xlane.xlu0 %289  ;;  %v649_v61 = vrot.slane %v3695_v39, %v4094_v0  ;;  %v1642_v62 = vcombine.low %v621_v46, %v625_v47  ;;  %v1643_v63 = vcombine.low %v629_v49, %v633_v50 }
  0xcd   : > { %v4110_v1 = vpop.eup %3704  ;;  %3720 = vpow2.f32 %v3606_v53  ;;  %v370_v2 = vadd.f32 %v4053_v35, %v290_v60  ;;  %v1644_v3 = vcombine.low %v637_v51, %v641_v55  ;;  %v653_v4 = vrot.slane %v3703_v58, %v4071_v18  ;;  %v335_v39 = vpop.xlane.xlu1 %334 }
  0xce   : > { %v3707_v6 = vpop.eup %3706  ;;  %3722 = vrcp.f32 %v509_v59  ;;  %v1645_v7 = vcombine.low %v645_v56, %v649_v61  ;;  %v1652_v8 = vrot.slane %v1642_v62, %v4097_v42  ;;  %v1659_v9 = vrot.slane %v1643_v63, %v4097_v42 }
  0xcf   : > { %v3709_v10 = vpop.eup %3708  ;;  %3724 = vrcp.f32 %v508_v54  ;;  %v3607_v11 = vmul.f32 -1.442695, %v370_v2  ;;  %v510_v12 = vadd.f32 1.0, %v3707_v6  ;;  %v1666_v13 = vrot.slane %v1644_v3, %v4097_v42 }
  0xd0   : > { %v4117_v14 = vpop.eup %3710  ;;  %v495_v15 = vadd.f32 1.0, %v3709_v10  ;;  %v293_v16 = vpop.xlane.xlu0 %292  ;;  %v1673_v17 = vrot.slane %v1645_v7, %v4097_v42  ;;  %v1674_v19 = vcombine.low %v1652_v8, %v1659_v9  ;;  %3726 = vpow2.f32 %v3621_v43 }
  0xd1   : > { %v4120_v20 = vpop.eup %3712  ;;  %3728 = vpow2.f32 %v3607_v11  ;;  %v371_v23 = vadd.f32 %v4053_v35, %v293_v16  ;;  %v657_v24 = vrot.slane %v3703_v58, %v4074_v21  ;;  %v661_v25 = vrot.slane %v3703_v58, %v4077_v22  ;;  %v338_v16 = vpop.xlane.xlu1 %337 }
  0xd2   : > { %v3715_v26 = vpop.eup %3714  ;;  %3730 = vrcp.f32 %v495_v15  ;;  %v1675_v27 = vcombine.low %v1666_v13, %v1673_v17  ;;  %v1682_v28 = vrot.slane %v1674_v19, %v4097_v42  ;;  %v665_v29 = vrot.slane %v3703_v58, %v4082_v32 }
  0xd3   : > { %v3717_v30 = vpop.eup %3716  ;;  %3732 = vrcp.f32 %v510_v12  ;;  %v3608_v31 = vmul.f32 -1.442695, %v371_v23  ;;  %v511_v36 = vadd.f32 1.0, %v3715_v26  ;;  %v669_v37 = vrot.slane %v3703_v58, %v4085_v33 }
  0xd4   : > { %v4128_v40 = vpop.eup %3718  ;;  %v496_v41 = vadd.f32 1.0, %v3717_v30  ;;  %v1689_v43 = vrot.slane %v1675_v27, %v4097_v42  ;;  %v673_v45 = vrot.slane %v3703_v58, %v4088_v34  ;;  %v677_v46 = vrot.slane %v3703_v58, %v4091_v38 }
  0xd5   : > { %3734 = vpow2.f32 %v3608_v31  ;;  %v681_v47 = vrot.slane %v3703_v58, %v4094_v0  ;;  %v1691_v48 = vcombine.low %v653_v4, %v657_v24  ;;  %v1692_v49 = vcombine.low %v661_v25, %v665_v29 }
  0xd6   : > { %3736 = vrcp.f32 %v496_v41  ;;  %v1690_v50 = vcombine.low %v1682_v28, %v1689_v43  ;;  %v1693_v51 = vcombine.low %v669_v37, %v673_v45  ;;  %v385_v52 = vadd.f32 %v4053_v35, %v335_v39 }
  0xd7   : > { %v3721_v53 = vpop.eup %3720  ;;  %3738 = vrcp.f32 %v511_v36  ;;  %v1694_v54 = vcombine.low %v677_v46, %v681_v47  ;;  %v1701_v55 = vrot.slane %v1691_v48, %v4097_v42  ;;  %v1708_v56 = vrot.slane %v1692_v49, %v4097_v42 }
  0xd8   : > { %v4137_v59 = vpop.eup %3722  ;;  %v497_v60 = vadd.f32 1.0, %v3721_v53  ;;  %3211 = vperm.xlu0 %3678, %v1690_v50   ;;  %v1715_v58 = vrot.slane %v1693_v51, %v4097_v42  ;;  %v3622_v61 = vmul.f32 -1.442695, %v385_v52  ;;  %v685_v62 = vrot.slane %v4099_v44, %v4071_v18 }
  0xd9   : > { %v4142_v63 = vpop.eup %3724  ;;  %v1722_v2 = vrot.slane %v1694_v54, %v4097_v42  ;;  %v1723_v3 = vcombine.low %v1701_v55, %v1708_v56  ;;  %v689_v4 = vrot.slane %v4099_v44, %v4074_v21  ;;  %v693_v6 = vrot.slane %v4099_v44, %v4077_v22  ;;  %v341_v55 = vpop.xlane.xlu1 %340 }
  0xda   : > { %v3727_v7 = vpop.eup %3726  ;;  %3740 = vrcp.f32 %v497_v60  ;;  %v697_v8 = vrot.slane %v4099_v44, %v4082_v32  ;;  %v701_v9 = vrot.slane %v4099_v44, %v4085_v33  ;;  %v705_v10 = vrot.slane %v4099_v44, %v4088_v34 }
  0xdb   : > { %v3729_v11 = vpop.eup %3728  ;;  %v512_v12 = vadd.f32 1.0, %v3727_v7  ;;  %v1724_v13 = vcombine.low %v1715_v58, %v1722_v2  ;;  %v1731_v15 = vrot.slane %v1723_v3, %v4097_v42  ;;  %3742 = vpow2.f32 %v3622_v61  ;;  %v296_v61 = vpop.xlane.xlu0 %295 }
  0xdc   : > { %v4156_v17 = vpop.eup %3730  ;;  %v498_v19 = vadd.f32 1.0, %v3729_v11  ;;  %v709_v23 = vrot.slane %v4099_v44, %v4091_v38  ;;  %v713_v24 = vrot.slane %v4099_v44, %v4094_v0  ;;  %v1740_v25 = vcombine.low %v685_v62, %v689_v4 }
  0xdd   : > { %v4162_v26 = vpop.eup %3732  ;;  %3744 = vrcp.f32 %v512_v12  ;;  %v1738_v27 = vrot.slane %v1724_v13, %v4097_v42  ;;  %v1741_v28 = vcombine.low %v693_v6, %v697_v8  ;;  %v1742_v29 = vcombine.low %v701_v9, %v705_v10 }
  0xde   : > { %3746 = vrcp.f32 %v498_v19  ;;  %v1743_v30 = vcombine.low %v709_v23, %v713_v24  ;;  %v1750_v31 = vrot.slane %v1740_v25, %v4097_v42  ;;  %v386_v36 = vadd.f32 %v4053_v35, %v338_v16 }
  0xdf   : > { %v3735_v37 = vpop.eup %3734  ;;  %v1739_v39 = vcombine.low %v1731_v15, %v1738_v27  ;;  %v1757_v41 = vrot.slane %v1741_v28, %v4097_v42  ;;  %v1764_v44 = vrot.slane %v1742_v29, %v4097_v42  ;;  %v717_v43 = vrot.slane %v4110_v1, %v4071_v18 }
  0xe0   : > { %v4171_v45 = vpop.eup %3736  ;;  %v499_v46 = vadd.f32 1.0, %v3735_v37  ;;  %v1771_v47 = vrot.slane %v1743_v30, %v4097_v42  ;;  %v3623_v48 = vmul.f32 -1.442695, %v386_v36  ;;  %v721_v49 = vrot.slane %v4110_v1, %v4074_v21 }
  0xe1   : > { %v4176_v50 = vpop.eup %3738  ;;  %3214 = vperm.xlu1 %3679, %v1739_v39   ;;  %v1772_v51 = vcombine.low %v1750_v31, %v1757_v41  ;;  %v725_v52 = vrot.slane %v4110_v1, %v4077_v22  ;;  %v729_v53 = vrot.slane %v4110_v1, %v4082_v32  ;;  %v733_v54 = vrot.slane %v4110_v1, %v4085_v33 }
  0xe2   : > { %3748 = vrcp.f32 %v499_v46  ;;  %v1773_v56 = vcombine.low %v1764_v44, %v1771_v47  ;;  %v737_v60 = vrot.slane %v4110_v1, %v4088_v34  ;;  %v741_v58 = vrot.slane %v4110_v1, %v4091_v38  ;;  %v299_v46 = vpop.xlane.xlu0 %298 }
  0xe3   : > { %v1780_v62 = vrot.slane %v1772_v51, %v4097_v42  ;;  %3750 = vpow2.f32 %v3623_v48  ;;  %v745_v2 = vrot.slane %v4110_v1, %v4094_v0  ;;  %v1789_v3 = vcombine.low %v717_v43, %v721_v49  ;;  %v344_v43 = vpop.xlane.xlu1 %343 }
  0xe4   : > { %v4191_v4 = vpop.eup %3740  ;;  %v1787_v6 = vrot.slane %v1773_v56, %v4097_v42  ;;  %v1790_v7 = vcombine.low %v725_v52, %v729_v53  ;;  %v1791_v8 = vcombine.low %v733_v54, %v737_v60  ;;  %v387_v9 = vadd.f32 %v4053_v35, %v341_v55 }
  0xe5   : > { %v3743_v10 = vpop.eup %3742  ;;  %v1792_v11 = vcombine.low %v741_v58, %v745_v2  ;;  %v1799_v12 = vrot.slane %v1789_v3, %v4097_v42  ;;  %v372_v13 = vadd.f32 %v4053_v35, %v296_v61  ;;  %v749_v15 = vrot.slane %v4117_v14, %v4071_v18 }
  0xe6   : > { %v513_v16 = vadd.f32 1.0, %v3743_v10  ;;  %v1788_v1 = vcombine.low %v1780_v62, %v1787_v6  ;;  %v1806_v19 = vrot.slane %v1790_v7, %v4097_v42  ;;  %v1813_v23 = vrot.slane %v1791_v8, %v4097_v42 }
  0xe7   : > { %v4201_v24 = vpop.eup %3744  ;;  %v1820_v25 = vrot.slane %v1792_v11, %v4097_v42  ;;  %v3624_v27 = vmul.f32 -1.442695, %v387_v9  ;;  %v3609_v28 = vmul.f32 -1.442695, %v372_v13  ;;  %v753_v29 = vrot.slane %v4117_v14, %v4074_v21 }
  0xe8   : > { %v4206_v30 = vpop.eup %3746  ;;  %3752 = vrcp.f32 %v513_v16  ;;  %3217 = vperm.xlu1 %3679, %v1788_v1   ;;  %v1821_v31 = vcombine.low %v1799_v12, %v1806_v19  ;;  %v757_v36 = vrot.slane %v4117_v14, %v4077_v22  ;;  %v761_v37 = vrot.slane %v4117_v14, %v4082_v32 }
  0xe9   : > { %v1822_v39 = vcombine.low %v1813_v23, %v1820_v25  ;;  %3754 = vpow2.f32 %v3624_v27  ;;  %v765_v41 = vrot.slane %v4117_v14, %v4085_v33  ;;  %v769_v44 = vrot.slane %v4117_v14, %v4088_v34  ;;  %v347_v23 = vpop.xlane.xlu1 %346  ;;  %v302_v25 = vpop.xlane.xlu0 %301 }
  0xea   : > { %v1829_v47 = vrot.slane %v1821_v31, %v4097_v42  ;;  %3756 = vpow2.f32 %v3609_v28  ;;  %v773_v48 = vrot.slane %v4117_v14, %v4091_v38  ;;  %v777_v49 = vrot.slane %v4117_v14, %v4094_v0 }
  0xeb   : > { %v1836_v51 = vrot.slane %v1822_v39, %v4097_v42  ;;  %v1838_v52 = vcombine.low %v749_v15, %v753_v29  ;;  %v1839_v53 = vcombine.low %v757_v36, %v761_v37  ;;  %v1840_v54 = vcombine.low %v765_v41, %v769_v44 }
  0xec   : > { %v4222_v55 = vpop.eup %3748  ;;  %v1841_v56 = vcombine.low %v773_v48, %v777_v49  ;;  %v388_v60 = vadd.f32 %v4053_v35, %v344_v43  ;;  %v373_v58 = vadd.f32 %v4053_v35, %v299_v46  ;;  %v781_v61 = vrot.slane %v4156_v17, %v4071_v18 }
  0xed   : > { %v3751_v62 = vpop.eup %3750  ;;  %v1837_v2 = vcombine.low %v1829_v47, %v1836_v51  ;;  %v1848_v3 = vrot.slane %v1838_v52, %v4097_v42  ;;  %v1855_v14 = vrot.slane %v1839_v53, %v4097_v42  ;;  %v1862_v6 = vrot.slane %v1840_v54, %v4097_v42 }
  0xee   : > { %v514_v7 = vadd.f32 1.0, %v3751_v62  ;;  %v1869_v8 = vrot.slane %v1841_v56, %v4097_v42  ;;  %v3625_v9 = vmul.f32 -1.442695, %v388_v60  ;;  %v3610_v10 = vmul.f32 -1.442695, %v373_v58 }
  0xef   : > { %3220 = vperm.xlu1 %3679, %v1837_v2   ;;  %v1870_v11 = vcombine.low %v1848_v3, %v1855_v14  ;;  %v785_v12 = vrot.slane %v4156_v17, %v4074_v21  ;;  %v789_v13 = vrot.slane %v4156_v17, %v4077_v22  ;;  %v793_v15 = vrot.slane %v4156_v17, %v4082_v32 }
  0xf0   : > { %3758 = vrcp.f32 %v514_v7  ;;  %v1871_v16 = vcombine.low %v1862_v6, %v1869_v8  ;;  %v797_v1 = vrot.slane %v4156_v17, %v4085_v33  ;;  %v801_v19 = vrot.slane %v4156_v17, %v4088_v34  ;;  %v350_v6 = vpop.xlane.xlu1 %349 }
  0xf1   : > { %v1878_v27 = vrot.slane %v1870_v11, %v4097_v42  ;;  %3760 = vpow2.f32 %v3625_v9  ;;  %v805_v28 = vrot.slane %v4156_v17, %v4091_v38  ;;  %v809_v29 = vrot.slane %v4156_v17, %v4094_v0 }
  0xf2   : > { %v4247_v31 = vpop.eup %3752  ;;  %v1885_v36 = vrot.slane %v1871_v16, %v4097_v42  ;;  %3762 = vpow2.f32 %v3610_v10  ;;  %v1887_v37 = vcombine.low %v781_v61, %v785_v12  ;;  %v1888_v39 = vcombine.low %v789_v13, %v793_v15  ;;  %v305_v10 = vpop.xlane.xlu0 %304 }
  0xf3   : > { %v3755_v41 = vpop.eup %3754  ;;  %v1889_v44 = vcombine.low %v797_v1, %v801_v19  ;;  %v1890_v43 = vcombine.low %v805_v28, %v809_v29  ;;  %v389_v46 = vadd.f32 %v4053_v35, %v347_v23  ;;  %v374_v47 = vadd.f32 %v4053_v35, %v302_v25 }
  0xf4   : > { %v3757_v48 = vpop.eup %3756  ;;  %v515_v49 = vadd.f32 1.0, %v3755_v41  ;;  %v1886_v51 = vcombine.low %v1878_v27, %v1885_v36  ;;  %v1897_v52 = vrot.slane %v1887_v37, %v4097_v42  ;;  %v1904_v17 = vrot.slane %v1888_v39, %v4097_v42 }
  0xf5   : > { %v500_v53 = vadd.f32 1.0, %v3757_v48  ;;  %v1911_v54 = vrot.slane %v1889_v44, %v4097_v42  ;;  %v1918_v56 = vrot.slane %v1890_v43, %v4097_v42  ;;  %v3626_v60 = vmul.f32 -1.442695, %v389_v46 }
  0xf6   : > { %3764 = vrcp.f32 %v515_v49  ;;  %3223 = vperm.xlu1 %3679, %v1886_v51   ;;  %v1919_v58 = vcombine.low %v1897_v52, %v1904_v17  ;;  %v3611_v61 = vmul.f32 -1.442695, %v374_v47  ;;  %v813_v62 = vrot.slane %v4171_v45, %v4071_v18 }
  0xf7   : > { %3766 = vrcp.f32 %v500_v53  ;;  %v1920_v2 = vcombine.low %v1911_v54, %v1918_v56  ;;  %v817_v3 = vrot.slane %v4171_v45, %v4074_v21  ;;  %v821_v14 = vrot.slane %v4171_v45, %v4077_v22  ;;  %v353_v56 = vpop.xlane.xlu1 %352 }
  0xf8   : > { %v1927_v7 = vrot.slane %v1919_v58, %v4097_v42  ;;  %3768 = vpow2.f32 %v3626_v60  ;;  %v825_v8 = vrot.slane %v4171_v45, %v4082_v32  ;;  %v829_v9 = vrot.slane %v4171_v45, %v4085_v33 }
  0xf9   : > { %v1934_v11 = vrot.slane %v1920_v2, %v4097_v42  ;;  %3770 = vpow2.f32 %v3611_v61  ;;  %v833_v12 = vrot.slane %v4171_v45, %v4088_v34  ;;  %v837_v13 = vrot.slane %v4171_v45, %v4091_v38  ;;  %v308_v2 = vpop.xlane.xlu0 %307 }
  0xfa   : > { %v4272_v15 = vpop.eup %3758  ;;  %v841_v16 = vrot.slane %v4171_v45, %v4094_v0  ;;  %v1936_v1 = vcombine.low %v813_v62, %v817_v3  ;;  %v1937_v19 = vcombine.low %v821_v14, %v825_v8  ;;  %v390_v23 = vadd.f32 %v4053_v35, %v350_v6 }
  0xfb   : > { %v3761_v25 = vpop.eup %3760  ;;  %v1935_v27 = vcombine.low %v1927_v7, %v1934_v11  ;;  %v1938_v28 = vcombine.low %v829_v9, %v833_v12  ;;  %v375_v29 = vadd.f32 %v4053_v35, %v305_v10  ;;  %v845_v36 = vrot.slane %v4191_v4, %v4071_v18 }
  0xfc   : > { %v3763_v37 = vpop.eup %3762  ;;  %v516_v39 = vadd.f32 1.0, %v3761_v25  ;;  %v1939_v41 = vcombine.low %v837_v13, %v841_v16  ;;  %v1946_v44 = vrot.slane %v1936_v1, %v4097_v42  ;;  %v1953_v43 = vrot.slane %v1937_v19, %v4097_v42 }
  0xfd   : > { %v501_v45 = vadd.f32 1.0, %v3763_v37  ;;  %3226 = vperm.xlu1 %3679, %v1935_v27   ;;  %v1960_v46 = vrot.slane %v1938_v28, %v4097_v42  ;;  %v3627_v47 = vmul.f32 -1.442695, %v390_v23  ;;  %v3612_v48 = vmul.f32 -1.442695, %v375_v29 }
  0xfe   : > { %3772 = vrcp.f32 %v516_v39  ;;  %v1967_v49 = vrot.slane %v1939_v41, %v4097_v42  ;;  %v1968_v51 = vcombine.low %v1946_v44, %v1953_v43  ;;  %v849_v52 = vrot.slane %v4191_v4, %v4074_v21 }
  0xff   : > { %3774 = vrcp.f32 %v501_v45  ;;  %v853_v17 = vrot.slane %v4191_v4, %v4077_v22  ;;  %v857_v53 = vrot.slane %v4191_v4, %v4082_v32  ;;  %v861_v54 = vrot.slane %v4191_v4, %v4085_v33 }
 0x100   : > { %v4292_v60 = vpop.eup %3764  ;;  %v1969_v58 = vcombine.low %v1960_v46, %v1967_v49  ;;  %v1976_v61 = vrot.slane %v1968_v51, %v4097_v42  ;;  %3776 = vpow2.f32 %v3627_v47  ;;  %v865_v62 = vrot.slane %v4191_v4, %v4088_v34  ;;  %v356_v47 = vpop.xlane.xlu1 %355 }
 0x101   : > { %v4297_v3 = vpop.eup %3766  ;;  %3778 = vpow2.f32 %v3612_v48  ;;  %v869_v14 = vrot.slane %v4191_v4, %v4091_v38  ;;  %v873_v6 = vrot.slane %v4191_v4, %v4094_v0  ;;  %v1985_v7 = vcombine.low %v845_v36, %v849_v52  ;;  %v311_v48 = vpop.xlane.xlu0 %310 }
 0x102   : > { %v3769_v8 = vpop.eup %3768  ;;  %v1983_v9 = vrot.slane %v1969_v58, %v4097_v42  ;;  %v1986_v10 = vcombine.low %v853_v17, %v857_v53  ;;  %v1987_v11 = vcombine.low %v861_v54, %v865_v62  ;;  %v391_v12 = vadd.f32 %v4053_v35, %v353_v56 }
 0x103   : > { %v3771_v13 = vpop.eup %3770  ;;  %v517_v16 = vadd.f32 1.0, %v3769_v8  ;;  %v1988_v1 = vcombine.low %v869_v14, %v873_v6  ;;  %v1995_v19 = vrot.slane %v1985_v7, %v4097_v42  ;;  %v376_v23 = vadd.f32 %v4053_v35, %v308_v2 }
 0x104   : > { %v502_v25 = vadd.f32 1.0, %v3771_v13  ;;  %v1984_v27 = vcombine.low %v1976_v61, %v1983_v9  ;;  %v2002_v28 = vrot.slane %v1986_v10, %v4097_v42  ;;  %v2009_v4 = vrot.slane %v1987_v11, %v4097_v42 }
 0x105   : > { %3780 = vrcp.f32 %v517_v16  ;;  %v2016_v29 = vrot.slane %v1988_v1, %v4097_v42  ;;  %v3628_v36 = vmul.f32 -1.442695, %v391_v12  ;;  %v3613_v37 = vmul.f32 -1.442695, %v376_v23 }
 0x106   : > { %3782 = vrcp.f32 %v502_v25  ;;  %3229 = vperm.xlu1 %3679, %v1984_v27   ;;  %v2017_v39 = vcombine.low %v1995_v19, %v2002_v28  ;;  %v877_v41 = vrot.slane %v4206_v30, %v4071_v18  ;;  %v881_v44 = vrot.slane %v4206_v30, %v4074_v21 }
 0x107   : > { %v2018_v43 = vcombine.low %v2009_v4, %v2016_v29  ;;  %3784 = vpow2.f32 %v3628_v36  ;;  %v885_v45 = vrot.slane %v4206_v30, %v4077_v22  ;;  %v889_v46 = vrot.slane %v4206_v30, %v4082_v32 }
 0x108   : > { %v4318_v49 = vpop.eup %3772  ;;  %v2025_v51 = vrot.slane %v2017_v39, %v4097_v42  ;;  %3786 = vpow2.f32 %v3613_v37  ;;  %v893_v52 = vrot.slane %v4206_v30, %v4085_v33  ;;  %v897_v17 = vrot.slane %v4206_v30, %v4088_v34 }
 0x109   : > { %v4325_v53 = vpop.eup %3774  ;;  %v2032_v54 = vrot.slane %v2018_v43, %v4097_v42  ;;  %v901_v56 = vrot.slane %v4206_v30, %v4091_v38  ;;  %v905_v58 = vrot.slane %v4206_v30, %v4094_v0  ;;  %v2034_v61 = vcombine.low %v877_v41, %v881_v44 }
 0x10a   : > { %v3777_v62 = vpop.eup %3776  ;;  %v2035_v2 = vcombine.low %v885_v45, %v889_v46  ;;  %v2036_v14 = vcombine.low %v893_v52, %v897_v17  ;;  %v392_v6 = vadd.f32 %v4053_v35, %v356_v47  ;;  %v377_v7 = vadd.f32 %v4053_v35, %v311_v48 }
 0x10b   : > { %v3779_v8 = vpop.eup %3778  ;;  %v518_v9 = vadd.f32 1.0, %v3777_v62  ;;  %v2033_v10 = vcombine.low %v2025_v51, %v2032_v54  ;;  %v2037_v11 = vcombine.low %v901_v56, %v905_v58  ;;  %v2044_v12 = vrot.slane %v2034_v61, %v4097_v42 }
 0x10c   : > { %v503_v13 = vadd.f32 1.0, %v3779_v8  ;;  %v2051_v16 = vrot.slane %v2035_v2, %v4097_v42  ;;  %v2058_v1 = vrot.slane %v2036_v14, %v4097_v42  ;;  %v3629_v30 = vmul.f32 -1.442695, %v392_v6 }
 0x10d   : > { %3788 = vrcp.f32 %v518_v9  ;;  %3232 = vperm.xlu1 %3679, %v2033_v10   ;;  %v2065_v19 = vrot.slane %v2037_v11, %v4097_v42  ;;  %v3614_v23 = vmul.f32 -1.442695, %v377_v7  ;;  %v1133_v25 = vrot.slane %v4120_v20, %v4071_v18  ;;  %v359_v9 = vpop.xlane.xlu1 %358 }
 0x10e   : > { %3790 = vrcp.f32 %v503_v13  ;;  %v2066_v27 = vcombine.low %v2044_v12, %v2051_v16  ;;  %v1137_v28 = vrot.slane %v4120_v20, %v4074_v21  ;;  %v1141_v4 = vrot.slane %v4120_v20, %v4077_v22 }
 0x10f   : > { %v4344_v29 = vpop.eup %3780  ;;  %v2067_v36 = vcombine.low %v2058_v1, %v2065_v19  ;;  %3792 = vpow2.f32 %v3629_v30  ;;  %v1145_v37 = vrot.slane %v4120_v20, %v4082_v32  ;;  %v1149_v39 = vrot.slane %v4120_v20, %v4085_v33 }
 0x110   : > { %v4350_v41 = vpop.eup %3782  ;;  %v2074_v44 = vrot.slane %v2066_v27, %v4097_v42  ;;  %3794 = vpow2.f32 %v3614_v23  ;;  %v1153_v43 = vrot.slane %v4120_v20, %v4088_v34  ;;  %v1157_v45 = vrot.slane %v4120_v20, %v4091_v38 }
 0x111   : > { %v3785_v46 = vpop.eup %3784  ;;  %v2081_v47 = vrot.slane %v2067_v36, %v4097_v42  ;;  %v1161_v48 = vrot.slane %v4120_v20, %v4094_v0  ;;  %v2426_v51 = vcombine.low %v1133_v25, %v1137_v28  ;;  %v2427_v52 = vcombine.low %v1141_v4, %v1145_v37 }
 0x112   : > { %v3787_v17 = vpop.eup %3786  ;;  %v519_v54 = vadd.f32 1.0, %v3785_v46  ;;  %v2428_v56 = vcombine.low %v1149_v39, %v1153_v43  ;;  %v909_v58 = vrot.slane %v4222_v55, %v4071_v18  ;;  %v913_v61 = vrot.slane %v4222_v55, %v4074_v21 }
 0x113   : > { %v504_v62 = vadd.f32 1.0, %v3787_v17  ;;  %v2082_v2 = vcombine.low %v2074_v44, %v2081_v47  ;;  %v2429_v14 = vcombine.low %v1157_v45, %v1161_v48  ;;  %v2436_v6 = vrot.slane %v2426_v51, %v4097_v42 }
 0x114   : > { %3796 = vrcp.f32 %v519_v54  ;;  %v2443_v7 = vrot.slane %v2427_v52, %v4097_v42  ;;  %v2450_v20 = vrot.slane %v2428_v56, %v4097_v42  ;;  %v917_v8 = vrot.slane %v4222_v55, %v4077_v22 }
 0x115   : > { %3798 = vrcp.f32 %v504_v62  ;;  %3235 = vperm.xlu1 %3679, %v2082_v2   ;;  %v2457_v10 = vrot.slane %v2429_v14, %v4097_v42  ;;  %v921_v11 = vrot.slane %v4222_v55, %v4082_v32  ;;  %v925_v12 = vrot.slane %v4222_v55, %v4085_v33 }
 0x116   : > { %v2458_v13 = vcombine.low %v2436_v6, %v2443_v7  ;;  %v929_v16 = vrot.slane %v4222_v55, %v4088_v34  ;;  %v933_v1 = vrot.slane %v4222_v55, %v4091_v38  ;;  %v937_v30 = vrot.slane %v4222_v55, %v4094_v0 }
 0x117   : > { %v4380_v19 = vpop.eup %3788  ;;  %v2459_v23 = vcombine.low %v2450_v20, %v2457_v10  ;;  %v2083_v25 = vcombine.low %v909_v58, %v913_v61  ;;  %v2084_v27 = vcombine.low %v917_v8, %v921_v11  ;;  %v393_v28 = vadd.f32 %v4053_v35, %v359_v9 }
 0x118   : > { %v4383_v4 = vpop.eup %3790  ;;  %v2466_v36 = vrot.slane %v2458_v13, %v4097_v42  ;;  %v2085_v37 = vcombine.low %v925_v12, %v929_v16  ;;  %v2086_v39 = vcombine.low %v933_v1, %v937_v30  ;;  %v1197_v44 = vrot.slane %v4142_v63, %v4071_v18 }
 0x119   : > { %v3793_v43 = vpop.eup %3792  ;;  %v2473_v45 = vrot.slane %v2459_v23, %v4097_v42  ;;  %v2093_v55 = vrot.slane %v2083_v25, %v4097_v42  ;;  %v2100_v46 = vrot.slane %v2084_v27, %v4097_v42  ;;  %v3630_v47 = vmul.f32 -1.442695, %v393_v28 }
 0x11a   : > { %v3795_v48 = vpop.eup %3794  ;;  %v520_v51 = vadd.f32 1.0, %v3793_v43  ;;  %v2107_v35 = vrot.slane %v2085_v37, %v4097_v42  ;;  %v2114_v52 = vrot.slane %v2086_v39, %v4097_v42  ;;  %v1201_v17 = vrot.slane %v4142_v63, %v4074_v21 }
 0x11b   : > { %v505_v54 = vadd.f32 1.0, %v3795_v48  ;;  %v2474_v56 = vcombine.low %v2466_v36, %v2473_v45  ;;  %v2115_v58 = vcombine.low %v2093_v55, %v2100_v46  ;;  %3800 = vpow2.f32 %v3630_v47 }
 0x11c   : > { %3802 = vrcp.f32 %v520_v51  ;;  %v2116_v61 = vcombine.low %v2107_v35, %v2114_v52  ;;  %v1205_v62 = vrot.slane %v4142_v63, %v4077_v22  ;;  %v1209_v2 = vrot.slane %v4142_v63, %v4082_v32 }
 0x11d   : > { %3804 = vrcp.f32 %v505_v54  ;;  %3259 = vperm.xlu1 %3679, %v2474_v56   ;;  %v2123_v14 = vrot.slane %v2115_v58, %v4097_v42  ;;  %v1213_v6 = vrot.slane %v4142_v63, %v4085_v33  ;;  %v1217_v7 = vrot.slane %v4142_v63, %v4088_v34 }
 0x11e   : > { %v4404_v20 = vpop.eup %3796  ;;  %v2130_v8 = vrot.slane %v2116_v61, %v4097_v42  ;;  %v1221_v9 = vrot.slane %v4142_v63, %v4091_v38  ;;  %v1225_v10 = vrot.slane %v4142_v63, %v4094_v0  ;;  %v2524_v11 = vcombine.low %v1197_v44, %v1201_v17 }
 0x11f   : > { %v4411_v12 = vpop.eup %3798  ;;  %v2525_v13 = vcombine.low %v1205_v62, %v1209_v2  ;;  %v2526_v16 = vcombine.low %v1213_v6, %v1217_v7  ;;  %v1165_v1 = vrot.slane %v4128_v40, %v4071_v18  ;;  %v1169_v30 = vrot.slane %v4128_v40, %v4074_v21 }
 0x120   : > { %v2131_v23 = vcombine.low %v2123_v14, %v2130_v8  ;;  %v2527_v25 = vcombine.low %v1221_v9, %v1225_v10  ;;  %v2534_v27 = vrot.slane %v2524_v11, %v4097_v42  ;;  %v1173_v28 = vrot.slane %v4128_v40, %v4077_v22 }
 0x121   : > { %v2541_v63 = vrot.slane %v2525_v13, %v4097_v42  ;;  %v2548_v36 = vrot.slane %v2526_v16, %v4097_v42  ;;  %v1177_v37 = vrot.slane %v4128_v40, %v4082_v32  ;;  %v1181_v39 = vrot.slane %v4128_v40, %v4085_v33 }
 0x122   : > { %3238 = vperm.xlu0 %3678, %v2131_v23   ;;  %v2555_v44 = vrot.slane %v2527_v25, %v4097_v42  ;;  %v1185_v43 = vrot.slane %v4128_v40, %v4088_v34  ;;  %v1189_v45 = vrot.slane %v4128_v40, %v4091_v38  ;;  %v1193_v55 = vrot.slane %v4128_v40, %v4094_v0 }
 0x123   : > { %v2556_v46 = vcombine.low %v2534_v27, %v2541_v63  ;;  %v2475_v47 = vcombine.low %v1165_v1, %v1169_v30  ;;  %v2476_v48 = vcombine.low %v1173_v28, %v1177_v37  ;;  %v1261_v51 = vrot.slane %v4162_v26, %v4071_v18 }
 0x124   : > { %v2557_v35 = vcombine.low %v2548_v36, %v2555_v44  ;;  %v2477_v52 = vcombine.low %v1181_v39, %v1185_v43  ;;  %v2478_v17 = vcombine.low %v1189_v45, %v1193_v55  ;;  %v1265_v54 = vrot.slane %v4162_v26, %v4074_v21 }
 0x125   : > { %v3801_v56 = vpop.eup %3800  ;;  %v2564_v58 = vrot.slane %v2556_v46, %v4097_v42  ;;  %v2485_v61 = vrot.slane %v2475_v47, %v4097_v42  ;;  %v2492_v62 = vrot.slane %v2476_v48, %v4097_v42  ;;  %v1269_v40 = vrot.slane %v4162_v26, %v4077_v22 }
 0x126   : > { %v4442_v2 = vpop.eup %3802  ;;  %v521_v14 = vadd.f32 1.0, %v3801_v56  ;;  %v2571_v6 = vrot.slane %v2557_v35, %v4097_v42  ;;  %v2499_v7 = vrot.slane %v2477_v52, %v4097_v42  ;;  %v2506_v8 = vrot.slane %v2478_v17, %v4097_v42 }
 0x127   : > { %v4447_v9 = vpop.eup %3804  ;;  %v2507_v10 = vcombine.low %v2485_v61, %v2492_v62  ;;  %v1273_v11 = vrot.slane %v4162_v26, %v4082_v32  ;;  %v1277_v13 = vrot.slane %v4162_v26, %v4085_v33  ;;  %v1281_v16 = vrot.slane %v4162_v26, %v4088_v34 }
 0x128   : > { %3806 = vrcp.f32 %v521_v14  ;;  %v2572_v1 = vcombine.low %v2564_v58, %v2571_v6  ;;  %v2508_v30 = vcombine.low %v2499_v7, %v2506_v8  ;;  %v1285_v23 = vrot.slane %v4162_v26, %v4091_v38 }
 0x129   : > { %v2515_v25 = vrot.slane %v2507_v10, %v4097_v42  ;;  %v1289_v27 = vrot.slane %v4162_v26, %v4094_v0  ;;  %v2622_v28 = vcombine.low %v1261_v51, %v1265_v54  ;;  %v2623_v63 = vcombine.low %v1269_v40, %v1273_v11 }
 0x12a   : > { %3265 = vperm.xlu1 %3679, %v2572_v1   ;;  %v2522_v36 = vrot.slane %v2508_v30, %v4097_v42  ;;  %v2624_v37 = vcombine.low %v1277_v13, %v1281_v16  ;;  %v1229_v39 = vrot.slane %v4137_v59, %v4071_v18  ;;  %v1233_v44 = vrot.slane %v4137_v59, %v4074_v21 }
 0x12b   : > { %v2625_v43 = vcombine.low %v1285_v23, %v1289_v27  ;;  %v2632_v45 = vrot.slane %v2622_v28, %v4097_v42  ;;  %v2639_v55 = vrot.slane %v2623_v63, %v4097_v42  ;;  %v1237_v26 = vrot.slane %v4137_v59, %v4077_v22 }
 0x12c   : > { %v2523_v46 = vcombine.low %v2515_v25, %v2522_v36  ;;  %v2646_v47 = vrot.slane %v2624_v37, %v4097_v42  ;;  %v1241_v48 = vrot.slane %v4137_v59, %v4082_v32  ;;  %v1245_v51 = vrot.slane %v4137_v59, %v4085_v33 }
 0x12d   : > { %v2653_v35 = vrot.slane %v2625_v43, %v4097_v42  ;;  %v2654_v52 = vcombine.low %v2632_v45, %v2639_v55  ;;  %v1249_v17 = vrot.slane %v4137_v59, %v4088_v34  ;;  %v1253_v54 = vrot.slane %v4137_v59, %v4091_v38 }
 0x12e   : > { %3262 = vperm.xlu0 %3678, %v2523_v46   ;;  %v1257_v56 = vrot.slane %v4137_v59, %v4094_v0  ;;  %v2573_v58 = vcombine.low %v1229_v39, %v1233_v44  ;;  %v2574_v61 = vcombine.low %v1237_v26, %v1241_v48  ;;  %v1325_v62 = vrot.slane %v4201_v24, %v4071_v18 }
 0x12f   : > { %v2655_v40 = vcombine.low %v2646_v47, %v2653_v35  ;;  %v2662_v14 = vrot.slane %v2654_v52, %v4097_v42  ;;  %v2575_v6 = vcombine.low %v1245_v51, %v1249_v17  ;;  %v1329_v7 = vrot.slane %v4201_v24, %v4074_v21 }
 0x130   : > { %v2576_v8 = vcombine.low %v1253_v54, %v1257_v56  ;;  %v2583_v10 = vrot.slane %v2573_v58, %v4097_v42  ;;  %v2590_v11 = vrot.slane %v2574_v61, %v4097_v42  ;;  %v1333_v59 = vrot.slane %v4201_v24, %v4077_v22 }
 0x131   : > { %v2669_v13 = vrot.slane %v2655_v40, %v4097_v42  ;;  %v2597_v16 = vrot.slane %v2575_v6, %v4097_v42  ;;  %v1337_v1 = vrot.slane %v4201_v24, %v4082_v32  ;;  %v1341_v30 = vrot.slane %v4201_v24, %v4085_v33 }
 0x132   : > { %v4496_v23 = vpop.eup %3806  ;;  %v2604_v25 = vrot.slane %v2576_v8, %v4097_v42  ;;  %v2605_v27 = vcombine.low %v2583_v10, %v2590_v11  ;;  %v1345_v28 = vrot.slane %v4201_v24, %v4088_v34  ;;  %v1349_v63 = vrot.slane %v4201_v24, %v4091_v38 }
 0x133   : > { %v2670_v36 = vcombine.low %v2662_v14, %v2669_v13  ;;  %v1353_v37 = vrot.slane %v4201_v24, %v4094_v0  ;;  %v2720_v39 = vcombine.low %v1325_v62, %v1329_v7  ;;  %v2721_v44 = vcombine.low %v1333_v59, %v1337_v1 }
 0x134   : > { %v2606_v43 = vcombine.low %v2597_v16, %v2604_v25  ;;  %v2613_v45 = vrot.slane %v2605_v27, %v4097_v42  ;;  %v2722_v55 = vcombine.low %v1341_v30, %v1345_v28  ;;  %v1293_v26 = vrot.slane %v4176_v50, %v4071_v18 }
 0x135   : > { %3271 = vperm.xlu1 %3679, %v2670_v36   ;;  %v2723_v46 = vcombine.low %v1349_v63, %v1353_v37  ;;  %v2730_v47 = vrot.slane %v2720_v39, %v4097_v42  ;;  %v2737_v48 = vrot.slane %v2721_v44, %v4097_v42  ;;  %v1297_v51 = vrot.slane %v4176_v50, %v4074_v21 }
 0x136   : > { %v2620_v24 = vrot.slane %v2606_v43, %v4097_v42  ;;  %v2744_v35 = vrot.slane %v2722_v55, %v4097_v42  ;;  %v1301_v52 = vrot.slane %v4176_v50, %v4077_v22  ;;  %v1305_v17 = vrot.slane %v4176_v50, %v4082_v32 }
 0x137   : > { %v2751_v54 = vrot.slane %v2723_v46, %v4097_v42  ;;  %v2752_v56 = vcombine.low %v2730_v47, %v2737_v48  ;;  %v1309_v58 = vrot.slane %v4176_v50, %v4085_v33  ;;  %v1313_v61 = vrot.slane %v4176_v50, %v4088_v34 }
 0x138   : > { %v2621_v62 = vcombine.low %v2613_v45, %v2620_v24  ;;  %v1317_v40 = vrot.slane %v4176_v50, %v4091_v38  ;;  %v1321_v14 = vrot.slane %v4176_v50, %v4094_v0  ;;  %v2671_v6 = vcombine.low %v1293_v26, %v1297_v51 }
 0x139   : > { %v2753_v7 = vcombine.low %v2744_v35, %v2751_v54  ;;  %v2760_v8 = vrot.slane %v2752_v56, %v4097_v42  ;;  %v2672_v10 = vcombine.low %v1301_v52, %v1305_v17  ;;  %v2673_v11 = vcombine.low %v1309_v58, %v1313_v61 }
 0x13a   : > { %3268 = vperm.xlu0 %3678, %v2621_v62   ;;  %v2674_v59 = vcombine.low %v1317_v40, %v1321_v14  ;;  %v2681_v13 = vrot.slane %v2671_v6, %v4097_v42  ;;  %v1389_v16 = vrot.slane %v4272_v15, %v4071_v18  ;;  %v1393_v1 = vrot.slane %v4272_v15, %v4074_v21 }
 0x13b   : > { %v2767_v30 = vrot.slane %v2753_v7, %v4097_v42  ;;  %v2688_v50 = vrot.slane %v2672_v10, %v4097_v42  ;;  %v2695_v25 = vrot.slane %v2673_v11, %v4097_v42  ;;  %v1397_v27 = vrot.slane %v4272_v15, %v4077_v22 }
 0x13c   : > { %v2702_v28 = vrot.slane %v2674_v59, %v4097_v42  ;;  %v1401_v63 = vrot.slane %v4272_v15, %v4082_v32  ;;  %v1405_v36 = vrot.slane %v4272_v15, %v4085_v33  ;;  %v1409_v37 = vrot.slane %v4272_v15, %v4088_v34 }
 0x13d   : > { %v2768_v39 = vcombine.low %v2760_v8, %v2767_v30  ;;  %v2703_v44 = vcombine.low %v2681_v13, %v2688_v50  ;;  %v1413_v43 = vrot.slane %v4272_v15, %v4091_v38  ;;  %v1417_v45 = vrot.slane %v4272_v15, %v4094_v0 }
 0x13e   : > { %v2704_v55 = vcombine.low %v2695_v25, %v2702_v28  ;;  %v2818_v26 = vcombine.low %v1389_v16, %v1393_v1  ;;  %v2819_v46 = vcombine.low %v1397_v27, %v1401_v63  ;;  %v2820_v47 = vcombine.low %v1405_v36, %v1409_v37 }
 0x13f   : > { %3277 = vperm.xlu1 %3679, %v2768_v39   ;;  %v2711_v48 = vrot.slane %v2703_v44, %v4097_v42  ;;  %v2821_v51 = vcombine.low %v1413_v43, %v1417_v45  ;;  %v1357_v24 = vrot.slane %v4247_v31, %v4071_v18  ;;  %v1361_v35 = vrot.slane %v4247_v31, %v4074_v21 }
 0x140   : > { %v2718_v52 = vrot.slane %v2704_v55, %v4097_v42  ;;  %v2828_v17 = vrot.slane %v2818_v26, %v4097_v42  ;;  %v2835_v15 = vrot.slane %v2819_v46, %v4097_v42  ;;  %v2842_v54 = vrot.slane %v2820_v47, %v4097_v42 }
 0x141   : > { %v2849_v56 = vrot.slane %v2821_v51, %v4097_v42  ;;  %v1365_v58 = vrot.slane %v4247_v31, %v4077_v22  ;;  %v1369_v61 = vrot.slane %v4247_v31, %v4082_v32  ;;  %v1373_v62 = vrot.slane %v4247_v31, %v4085_v33 }
 0x142   : > { %v2719_v40 = vcombine.low %v2711_v48, %v2718_v52  ;;  %v2850_v14 = vcombine.low %v2828_v17, %v2835_v15  ;;  %v1377_v6 = vrot.slane %v4247_v31, %v4088_v34  ;;  %v1381_v7 = vrot.slane %v4247_v31, %v4091_v38 }
 0x143   : > { %v2851_v8 = vcombine.low %v2842_v54, %v2849_v56  ;;  %v1385_v10 = vrot.slane %v4247_v31, %v4094_v0  ;;  %v2769_v11 = vcombine.low %v1357_v24, %v1361_v35  ;;  %v2770_v59 = vcombine.low %v1365_v58, %v1369_v61 }
 0x144   : > { %3274 = vperm.xlu0 %3678, %v2719_v40   ;;  %v2858_v13 = vrot.slane %v2850_v14, %v4097_v42  ;;  %v2771_v16 = vcombine.low %v1373_v62, %v1377_v6  ;;  %v1421_v1 = vrot.slane %v4292_v60, %v4071_v18  ;;  %v1425_v30 = vrot.slane %v4292_v60, %v4074_v21 }
 0x145   : > { %v2865_v50 = vrot.slane %v2851_v8, %v4097_v42  ;;  %v2772_v25 = vcombine.low %v1381_v7, %v1385_v10  ;;  %v2779_v27 = vrot.slane %v2769_v11, %v4097_v42  ;;  %v2786_v28 = vrot.slane %v2770_v59, %v4097_v42 }
 0x146   : > { %v2793_v31 = vrot.slane %v2771_v16, %v4097_v42  ;;  %v1429_v63 = vrot.slane %v4292_v60, %v4077_v22  ;;  %v1433_v36 = vrot.slane %v4292_v60, %v4082_v32  ;;  %v1437_v37 = vrot.slane %v4292_v60, %v4085_v33 }
 0x147   : > { %v2866_v39 = vcombine.low %v2858_v13, %v2865_v50  ;;  %v2800_v44 = vrot.slane %v2772_v25, %v4097_v42  ;;  %v2801_v43 = vcombine.low %v2779_v27, %v2786_v28  ;;  %v1441_v45 = vrot.slane %v4292_v60, %v4088_v34 }
 0x148   : > { %v1445_v55 = vrot.slane %v4292_v60, %v4091_v38  ;;  %v1449_v26 = vrot.slane %v4292_v60, %v4094_v0  ;;  %v2867_v46 = vcombine.low %v1421_v1, %v1425_v30  ;;  %v2868_v47 = vcombine.low %v1429_v63, %v1433_v36 }
 0x149   : > { %3283 = vperm.xlu1 %3679, %v2866_v39   ;;  %v2802_v48 = vcombine.low %v2793_v31, %v2800_v44  ;;  %v2809_v51 = vrot.slane %v2801_v43, %v4097_v42  ;;  %v2869_v24 = vcombine.low %v1437_v37, %v1441_v45  ;;  %v941_v35 = vrot.slane %v4297_v3, %v4071_v18 }
 0x14a   : > { %v2870_v52 = vcombine.low %v1445_v55, %v1449_v26  ;;  %v2877_v17 = vrot.slane %v2867_v46, %v4097_v42  ;;  %v2884_v15 = vrot.slane %v2868_v47, %v4097_v42  ;;  %v945_v54 = vrot.slane %v4297_v3, %v4074_v21 }
 0x14b   : > { %v2816_v60 = vrot.slane %v2802_v48, %v4097_v42  ;;  %v2891_v56 = vrot.slane %v2869_v24, %v4097_v42  ;;  %v949_v58 = vrot.slane %v4297_v3, %v4077_v22  ;;  %v953_v61 = vrot.slane %v4297_v3, %v4082_v32 }
 0x14c   : > { %v2898_v62 = vrot.slane %v2870_v52, %v4097_v42  ;;  %v2899_v40 = vcombine.low %v2877_v17, %v2884_v15  ;;  %v957_v14 = vrot.slane %v4297_v3, %v4085_v33  ;;  %v961_v6 = vrot.slane %v4297_v3, %v4088_v34 }
 0x14d   : > { %v2817_v7 = vcombine.low %v2809_v51, %v2816_v60  ;;  %v965_v8 = vrot.slane %v4297_v3, %v4091_v38  ;;  %v969_v10 = vrot.slane %v4297_v3, %v4094_v0  ;;  %v2132_v11 = vcombine.low %v941_v35, %v945_v54 }
 0x14e   : > { %v2900_v59 = vcombine.low %v2891_v56, %v2898_v62  ;;  %v2907_v13 = vrot.slane %v2899_v40, %v4097_v42  ;;  %v2133_v16 = vcombine.low %v949_v58, %v953_v61  ;;  %v2134_v1 = vcombine.low %v957_v14, %v961_v6 }
 0x14f   : > { %3280 = vperm.xlu0 %3678, %v2817_v7   ;;  %v2135_v30 = vcombine.low %v965_v8, %v969_v10  ;;  %v2142_v50 = vrot.slane %v2132_v11, %v4097_v42  ;;  %v1453_v25 = vrot.slane %v4318_v49, %v4071_v18  ;;  %v1457_v27 = vrot.slane %v4318_v49, %v4074_v21 }
 0x150   : > { %v2914_v28 = vrot.slane %v2900_v59, %v4097_v42  ;;  %v2149_v3 = vrot.slane %v2133_v16, %v4097_v42  ;;  %v2156_v31 = vrot.slane %v2134_v1, %v4097_v42  ;;  %v1461_v63 = vrot.slane %v4318_v49, %v4077_v22 }
 0x151   : > { %v2163_v36 = vrot.slane %v2135_v30, %v4097_v42  ;;  %v1465_v37 = vrot.slane %v4318_v49, %v4082_v32  ;;  %v1469_v39 = vrot.slane %v4318_v49, %v4085_v33  ;;  %v1473_v44 = vrot.slane %v4318_v49, %v4088_v34 }
 0x152   : > { %v2915_v43 = vcombine.low %v2907_v13, %v2914_v28  ;;  %v2164_v45 = vcombine.low %v2142_v50, %v2149_v3  ;;  %v1477_v55 = vrot.slane %v4318_v49, %v4091_v38  ;;  %v1481_v26 = vrot.slane %v4318_v49, %v4094_v0 }
 0x153   : > { %v2165_v46 = vcombine.low %v2156_v31, %v2163_v36  ;;  %v2916_v47 = vcombine.low %v1453_v25, %v1457_v27  ;;  %v2917_v48 = vcombine.low %v1461_v63, %v1465_v37  ;;  %v2918_v51 = vcombine.low %v1469_v39, %v1473_v44 }
 0x154   : > { %3286 = vperm.xlu0 %3678, %v2915_v43   ;;  %v2172_v24 = vrot.slane %v2164_v45, %v4097_v42  ;;  %v2919_v35 = vcombine.low %v1477_v55, %v1481_v26  ;;  %v973_v52 = vrot.slane %v4325_v53, %v4071_v18  ;;  %v977_v17 = vrot.slane %v4325_v53, %v4074_v21 }
 0x155   : > { %v2179_v15 = vrot.slane %v2165_v46, %v4097_v42  ;;  %v2926_v54 = vrot.slane %v2916_v47, %v4097_v42  ;;  %v2933_v49 = vrot.slane %v2917_v48, %v4097_v42  ;;  %v2940_v60 = vrot.slane %v2918_v51, %v4097_v42 }
 0x156   : > { %v2947_v56 = vrot.slane %v2919_v35, %v4097_v42  ;;  %v981_v58 = vrot.slane %v4325_v53, %v4077_v22  ;;  %v985_v61 = vrot.slane %v4325_v53, %v4082_v32  ;;  %v989_v62 = vrot.slane %v4325_v53, %v4085_v33 }
 0x157   : > { %v2180_v40 = vcombine.low %v2172_v24, %v2179_v15  ;;  %v2948_v14 = vcombine.low %v2926_v54, %v2933_v49  ;;  %v993_v6 = vrot.slane %v4325_v53, %v4088_v34  ;;  %v997_v7 = vrot.slane %v4325_v53, %v4091_v38 }
 0x158   : > { %v2949_v8 = vcombine.low %v2940_v60, %v2947_v56  ;;  %v1001_v10 = vrot.slane %v4325_v53, %v4094_v0  ;;  %v2181_v11 = vcombine.low %v973_v52, %v977_v17  ;;  %v2182_v59 = vcombine.low %v981_v58, %v985_v61 }
 0x159   : > { %3241 = vperm.xlu1 %3679, %v2180_v40   ;;  %v2956_v13 = vrot.slane %v2948_v14, %v4097_v42  ;;  %v2183_v16 = vcombine.low %v989_v62, %v993_v6  ;;  %v1485_v1 = vrot.slane %v4344_v29, %v4071_v18  ;;  %v1489_v30 = vrot.slane %v4344_v29, %v4074_v21 }
 0x15a   : > { %v2963_v50 = vrot.slane %v2949_v8, %v4097_v42  ;;  %v2184_v25 = vcombine.low %v997_v7, %v1001_v10  ;;  %v2191_v27 = vrot.slane %v2181_v11, %v4097_v42  ;;  %v2198_v28 = vrot.slane %v2182_v59, %v4097_v42 }
 0x15b   : > { %v2205_v53 = vrot.slane %v2183_v16, %v4097_v42  ;;  %v1493_v3 = vrot.slane %v4344_v29, %v4077_v22  ;;  %v1497_v31 = vrot.slane %v4344_v29, %v4082_v32  ;;  %v1501_v63 = vrot.slane %v4344_v29, %v4085_v33 }
 0x15c   : > { %v2964_v36 = vcombine.low %v2956_v13, %v2963_v50  ;;  %v2212_v37 = vrot.slane %v2184_v25, %v4097_v42  ;;  %v2213_v39 = vcombine.low %v2191_v27, %v2198_v28  ;;  %v1505_v44 = vrot.slane %v4344_v29, %v4088_v34 }
 0x15d   : > { %v1509_v43 = vrot.slane %v4344_v29, %v4091_v38  ;;  %v1513_v45 = vrot.slane %v4344_v29, %v4094_v0  ;;  %v2965_v55 = vcombine.low %v1485_v1, %v1489_v30  ;;  %v2966_v26 = vcombine.low %v1493_v3, %v1497_v31 }
 0x15e   : > { %3289 = vperm.xlu0 %3678, %v2964_v36   ;;  %v2214_v46 = vcombine.low %v2205_v53, %v2212_v37  ;;  %v2221_v47 = vrot.slane %v2213_v39, %v4097_v42  ;;  %v2967_v48 = vcombine.low %v1501_v63, %v1505_v44  ;;  %v1005_v51 = vrot.slane %v4350_v41, %v4071_v18 }
 0x15f   : > { %v2968_v24 = vcombine.low %v1509_v43, %v1513_v45  ;;  %v2975_v35 = vrot.slane %v2965_v55, %v4097_v42  ;;  %v2982_v52 = vrot.slane %v2966_v26, %v4097_v42  ;;  %v1009_v17 = vrot.slane %v4350_v41, %v4074_v21 }
 0x160   : > { %v2228_v29 = vrot.slane %v2214_v46, %v4097_v42  ;;  %v2989_v15 = vrot.slane %v2967_v48, %v4097_v42  ;;  %v1013_v54 = vrot.slane %v4350_v41, %v4077_v22  ;;  %v1017_v49 = vrot.slane %v4350_v41, %v4082_v32 }
 0x161   : > { %v2996_v60 = vrot.slane %v2968_v24, %v4097_v42  ;;  %v2997_v56 = vcombine.low %v2975_v35, %v2982_v52  ;;  %v1021_v58 = vrot.slane %v4350_v41, %v4085_v33  ;;  %v1025_v61 = vrot.slane %v4350_v41, %v4088_v34 }
 0x162   : > { %v2229_v62 = vcombine.low %v2221_v47, %v2228_v29  ;;  %v1029_v40 = vrot.slane %v4350_v41, %v4091_v38  ;;  %v1033_v14 = vrot.slane %v4350_v41, %v4094_v0  ;;  %v2230_v6 = vcombine.low %v1005_v51, %v1009_v17 }
 0x163   : > { %v2998_v7 = vcombine.low %v2989_v15, %v2996_v60  ;;  %v3005_v8 = vrot.slane %v2997_v56, %v4097_v42  ;;  %v2231_v10 = vcombine.low %v1013_v54, %v1017_v49  ;;  %v2232_v11 = vcombine.low %v1021_v58, %v1025_v61 }
 0x164   : > { %3244 = vperm.xlu1 %3679, %v2229_v62   ;;  %v2233_v59 = vcombine.low %v1029_v40, %v1033_v14  ;;  %v2240_v13 = vrot.slane %v2230_v6, %v4097_v42  ;;  %v1517_v16 = vrot.slane %v4380_v19, %v4071_v18  ;;  %v1521_v1 = vrot.slane %v4380_v19, %v4074_v21 }
 0x165   : > { %v3012_v30 = vrot.slane %v2998_v7, %v4097_v42  ;;  %v2247_v41 = vrot.slane %v2231_v10, %v4097_v42  ;;  %v2254_v50 = vrot.slane %v2232_v11, %v4097_v42  ;;  %v1525_v25 = vrot.slane %v4380_v19, %v4077_v22 }
 0x166   : > { %v2261_v27 = vrot.slane %v2233_v59, %v4097_v42  ;;  %v1529_v28 = vrot.slane %v4380_v19, %v4082_v32  ;;  %v1533_v53 = vrot.slane %v4380_v19, %v4085_v33  ;;  %v1537_v3 = vrot.slane %v4380_v19, %v4088_v34 }
 0x167   : > { %v3013_v31 = vcombine.low %v3005_v8, %v3012_v30  ;;  %v2262_v63 = vcombine.low %v2240_v13, %v2247_v41  ;;  %v1541_v36 = vrot.slane %v4380_v19, %v4091_v38  ;;  %v1545_v37 = vrot.slane %v4380_v19, %v4094_v0 }
 0x168   : > { %v2263_v39 = vcombine.low %v2254_v50, %v2261_v27  ;;  %v3014_v44 = vcombine.low %v1517_v16, %v1521_v1  ;;  %v3015_v43 = vcombine.low %v1525_v25, %v1529_v28  ;;  %v3016_v45 = vcombine.low %v1533_v53, %v1537_v3 }
 0x169   : > { %3292 = vperm.xlu0 %3678, %v3013_v31   ;;  %v2270_v55 = vrot.slane %v2262_v63, %v4097_v42  ;;  %v3017_v26 = vcombine.low %v1541_v36, %v1545_v37  ;;  %v1037_v46 = vrot.slane %v4383_v4, %v4071_v18  ;;  %v1041_v47 = vrot.slane %v4383_v4, %v4074_v21 }
 0x16a   : > { %v2277_v48 = vrot.slane %v2263_v39, %v4097_v42  ;;  %v3024_v51 = vrot.slane %v3014_v44, %v4097_v42  ;;  %v3031_v19 = vrot.slane %v3015_v43, %v4097_v42  ;;  %v3038_v24 = vrot.slane %v3016_v45, %v4097_v42 }
 0x16b   : > { %v3045_v35 = vrot.slane %v3017_v26, %v4097_v42  ;;  %v1045_v52 = vrot.slane %v4383_v4, %v4077_v22  ;;  %v1049_v17 = vrot.slane %v4383_v4, %v4082_v32  ;;  %v1053_v29 = vrot.slane %v4383_v4, %v4085_v33 }
 0x16c   : > { %v2278_v15 = vcombine.low %v2270_v55, %v2277_v48  ;;  %v3046_v54 = vcombine.low %v3024_v51, %v3031_v19  ;;  %v1057_v49 = vrot.slane %v4383_v4, %v4088_v34  ;;  %v1061_v60 = vrot.slane %v4383_v4, %v4091_v38 }
 0x16d   : > { %v3047_v56 = vcombine.low %v3038_v24, %v3045_v35  ;;  %v1065_v58 = vrot.slane %v4383_v4, %v4094_v0  ;;  %v2279_v61 = vcombine.low %v1037_v46, %v1041_v47  ;;  %v2280_v62 = vcombine.low %v1045_v52, %v1049_v17 }
 0x16e   : > { %3247 = vperm.xlu1 %3679, %v2278_v15   ;;  %v3054_v40 = vrot.slane %v3046_v54, %v4097_v42  ;;  %v2281_v14 = vcombine.low %v1053_v29, %v1057_v49  ;;  %v1549_v6 = vrot.slane %v4404_v20, %v4071_v18  ;;  %v1553_v7 = vrot.slane %v4404_v20, %v4074_v21 }
 0x16f   : > { %v3061_v8 = vrot.slane %v3047_v56, %v4097_v42  ;;  %v2282_v10 = vcombine.low %v1061_v60, %v1065_v58  ;;  %v2289_v11 = vrot.slane %v2279_v61, %v4097_v42  ;;  %v2296_v59 = vrot.slane %v2280_v62, %v4097_v42 }
 0x170   : > { %v2303_v4 = vrot.slane %v2281_v14, %v4097_v42  ;;  %v1557_v13 = vrot.slane %v4404_v20, %v4077_v22  ;;  %v1561_v16 = vrot.slane %v4404_v20, %v4082_v32  ;;  %v1565_v1 = vrot.slane %v4404_v20, %v4085_v33 }
 0x171   : > { %v3062_v30 = vcombine.low %v3054_v40, %v3061_v8  ;;  %v2310_v41 = vrot.slane %v2282_v10, %v4097_v42  ;;  %v2311_v50 = vcombine.low %v2289_v11, %v2296_v59  ;;  %v1569_v25 = vrot.slane %v4404_v20, %v4088_v34 }
 0x172   : > { %v1573_v27 = vrot.slane %v4404_v20, %v4091_v38  ;;  %v1577_v28 = vrot.slane %v4404_v20, %v4094_v0  ;;  %v3063_v53 = vcombine.low %v1549_v6, %v1553_v7  ;;  %v3064_v3 = vcombine.low %v1557_v13, %v1561_v16 }
 0x173   : > { %3295 = vperm.xlu0 %3678, %v3062_v30   ;;  %v2312_v31 = vcombine.low %v2303_v4, %v2310_v41  ;;  %v2319_v63 = vrot.slane %v2311_v50, %v4097_v42  ;;  %v3065_v36 = vcombine.low %v1565_v1, %v1569_v25  ;;  %v1069_v37 = vrot.slane %v4411_v12, %v4071_v18 }
 0x174   : > { %v3066_v39 = vcombine.low %v1573_v27, %v1577_v28  ;;  %v3073_v44 = vrot.slane %v3063_v53, %v4097_v42  ;;  %v3080_v43 = vrot.slane %v3064_v3, %v4097_v42  ;;  %v1073_v45 = vrot.slane %v4411_v12, %v4074_v21 }
 0x175   : > { %v2326_v20 = vrot.slane %v2312_v31, %v4097_v42  ;;  %v3087_v55 = vrot.slane %v3065_v36, %v4097_v42  ;;  %v1077_v26 = vrot.slane %v4411_v12, %v4077_v22  ;;  %v1081_v46 = vrot.slane %v4411_v12, %v4082_v32 }
 0x176   : > { %v3094_v47 = vrot.slane %v3066_v39, %v4097_v42  ;;  %v3095_v48 = vcombine.low %v3073_v44, %v3080_v43  ;;  %v1085_v51 = vrot.slane %v4411_v12, %v4085_v33  ;;  %v1089_v19 = vrot.slane %v4411_v12, %v4088_v34 }
 0x177   : > { %v2327_v24 = vcombine.low %v2319_v63, %v2326_v20  ;;  %v1093_v35 = vrot.slane %v4411_v12, %v4091_v38  ;;  %v1097_v52 = vrot.slane %v4411_v12, %v4094_v0  ;;  %v2328_v17 = vcombine.low %v1069_v37, %v1073_v45 }
 0x178   : > { %v3096_v29 = vcombine.low %v3087_v55, %v3094_v47  ;;  %v3103_v15 = vrot.slane %v3095_v48, %v4097_v42  ;;  %v2329_v54 = vcombine.low %v1077_v26, %v1081_v46  ;;  %v2330_v49 = vcombine.low %v1085_v51, %v1089_v19 }
 0x179   : > { %3250 = vperm.xlu1 %3679, %v2327_v24   ;;  %v2331_v60 = vcombine.low %v1093_v35, %v1097_v52  ;;  %v2338_v56 = vrot.slane %v2328_v17, %v4097_v42  ;;  %v1581_v58 = vrot.slane %v4442_v2, %v4071_v18  ;;  %v1585_v61 = vrot.slane %v4442_v2, %v4074_v21 }
 0x17a   : > { %v3110_v62 = vrot.slane %v3096_v29, %v4097_v42  ;;  %v2345_v12 = vrot.slane %v2329_v54, %v4097_v42  ;;  %v2352_v40 = vrot.slane %v2330_v49, %v4097_v42  ;;  %v1589_v14 = vrot.slane %v4442_v2, %v4077_v22 }
 0x17b   : > { %v2359_v6 = vrot.slane %v2331_v60, %v4097_v42  ;;  %v1593_v7 = vrot.slane %v4442_v2, %v4082_v32  ;;  %v1597_v8 = vrot.slane %v4442_v2, %v4085_v33  ;;  %v1601_v10 = vrot.slane %v4442_v2, %v4088_v34 }
 0x17c   : > { %v3111_v11 = vcombine.low %v3103_v15, %v3110_v62  ;;  %v2360_v59 = vcombine.low %v2338_v56, %v2345_v12  ;;  %v1605_v4 = vrot.slane %v4442_v2, %v4091_v38  ;;  %v1609_v13 = vrot.slane %v4442_v2, %v4094_v0 }
 0x17d   : > { %v2361_v16 = vcombine.low %v2352_v40, %v2359_v6  ;;  %v3112_v1 = vcombine.low %v1581_v58, %v1585_v61  ;;  %v3113_v30 = vcombine.low %v1589_v14, %v1593_v7  ;;  %v3114_v41 = vcombine.low %v1597_v8, %v1601_v10 }
 0x17e   : > { %3298 = vperm.xlu0 %3678, %v3111_v11   ;;  %v2368_v50 = vrot.slane %v2360_v59, %v4097_v42  ;;  %v3115_v25 = vcombine.low %v1605_v4, %v1609_v13  ;;  %v1101_v27 = vrot.slane %v4447_v9, %v4071_v18  ;;  %v1105_v28 = vrot.slane %v4447_v9, %v4074_v21  ;;  %v3215_v4 = vpop.permute.xlu1 %3214 }
 0x17f   : > { %v2375_v53 = vrot.slane %v2361_v16, %v4097_v42  ;;  %v3122_v3 = vrot.slane %v3112_v1, %v4097_v42  ;;  %v3129_v2 = vrot.slane %v3113_v30, %v4097_v42  ;;  %v3136_v31 = vrot.slane %v3114_v41, %v4097_v42 }
 0x180   : > { %v3143_v63 = vrot.slane %v3115_v25, %v4097_v42  ;;  %v1109_v36 = vrot.slane %v4447_v9, %v4077_v22  ;;  %v1113_v37 = vrot.slane %v4447_v9, %v4082_v32  ;;  %v1117_v39 = vrot.slane %v4447_v9, %v4085_v33  ;;  %v3212_v25 = vpop.permute.xlu0 %3211 }
 0x181   : > { %v2376_v44 = vcombine.low %v2368_v50, %v2375_v53  ;;  %v3144_v43 = vcombine.low %v3122_v3, %v3129_v2  ;;  %v1121_v45 = vrot.slane %v4447_v9, %v4088_v34  ;;  %v1125_v20 = vrot.slane %v4447_v9, %v4091_v38 }
 0x182   : > { %v3145_v55 = vcombine.low %v3136_v31, %v3143_v63  ;;  %v1129_v26 = vrot.slane %v4447_v9, %v4094_v0  ;;  %v2377_v46 = vcombine.low %v1101_v27, %v1105_v28  ;;  %v2378_v47 = vcombine.low %v1109_v36, %v1113_v37  ;;  %v3218_v13 = vpop.permute.xlu1 %3217 }
 0x183   : > { %3253 = vperm.xlu1 %3679, %v2376_v44   ;;  %v3152_v48 = vrot.slane %v3144_v43, %v4097_v42  ;;  %v2379_v51 = vcombine.low %v1117_v39, %v1121_v45  ;;  %v1613_v19 = vrot.slane %v4496_v23, %v4071_v18  ;;  %v1617_v24 = vrot.slane %v4496_v23, %v4074_v21 }
 0x184   : > { %v3159_v35 = vrot.slane %v3145_v55, %v4097_v42  ;;  %v2380_v52 = vcombine.low %v1125_v20, %v1129_v26  ;;  %v2387_v17 = vrot.slane %v2377_v46, %v4097_v42  ;;  %v2394_v29 = vrot.slane %v2378_v47, %v4097_v42 }
 0x185   : > { %v2401_v9 = vrot.slane %v2379_v51, %v4097_v42  ;;  %v1621_v15 = vrot.slane %v4496_v23, %v4077_v22  ;;  %v1625_v54 = vrot.slane %v4496_v23, %v4082_v32  ;;  %v1629_v18 = vrot.slane %v4496_v23, %v4085_v33 }
 0x186   : > { %v3160_v49 = vcombine.low %v3152_v48, %v3159_v35  ;;  %v2408_v21 = vrot.slane %v2380_v52, %v4097_v42  ;;  %v2409_v60 = vcombine.low %v2387_v17, %v2394_v29  ;;  %v1633_v56 = vrot.slane %v4496_v23, %v4088_v34  ;;  %v3221_v16 = vpop.permute.xlu1 %3220 }
 0x187   : > { %v1637_v58 = vrot.slane %v4496_v23, %v4091_v38  ;;  %v1641_v61 = vrot.slane %v4496_v23, %v4094_v0  ;;  %v3161_v22 = vcombine.low %v1613_v19, %v1617_v24  ;;  %v3162_v62 = vcombine.low %v1621_v15, %v1625_v54 }
 0x188   : > { %3301 = vperm.xlu0 %3678, %v3160_v49   ;;  %v2410_v32 = vcombine.low %v2401_v9, %v2408_v21  ;;  %v2417_v12 = vrot.slane %v2409_v60, %v4097_v42  ;;  %v3163_v33 = vcombine.low %v1629_v18, %v1633_v56  ;;  %v4892_v20 = vand.u32 127, %v618_v57 }
 0x189   : > { %v3164_v40 = vcombine.low %v1637_v58, %v1641_v61  ;;  %v3171_v14 = vrot.slane %v3161_v22, %v4097_v42  ;;  %v3178_v6 = vrot.slane %v3162_v62, %v4097_v42 }
 0x18a   : > { %v2424_v34 = vrot.slane %v2410_v32, %v4097_v42  ;;  %v3185_v7 = vrot.slane %v3163_v33, %v4097_v42  ;;  %v4865_v1 = vpop.permute.xlu1 %3223  ;;  %v3312_v55 = vadd.s32 4294967288, %v4892_v20  ;;  %v3319_v46 = vadd.s32 4294967280, %v4892_v20 }
 0x18b   : > { %v3192_v38 = vrot.slane %v3164_v40, %v4097_v42  ;;  %v3193_v8 = vcombine.low %v3171_v14, %v3178_v6  ;;  %v3326_v47 = vadd.s32 4294967272, %v4892_v20  ;;  %v3333_v19 = vadd.s32 4294967264, %v4892_v20 }
 0x18c   : > { %v2425_v0 = vcombine.low %v2417_v12, %v2424_v34  ;;  %v3315_v51 = vsub.s32 %v3312_v55, %v4066_v5  ;;  %v3322_v24 = vsub.s32 %v3319_v46, %v4066_v5  ;;  %v3340_v35 = vadd.s32 4294967256, %v4892_v20 }
 0x18d   : > { %v3194_v23 = vcombine.low %v3185_v7, %v3192_v38  ;;  %v3201_v10 = vrot.slane %v3193_v8, %v4097_v42  ;;  %v3310_v52 = vsub.s32 %v4892_v20, %v4066_v5  ;;  %v3329_v17 = vsub.s32 %v3326_v47, %v4066_v5 }
 0x18e   : > { %3256 = vperm.xlu1 %3679, %v2425_v0   ;;  %v4867_v30 = vpop.permute.xlu1 %3226  ;;  %v3316_v15 = vrot.slane %v3215_v4, %v3315_v51  ;;  %v3336_v54 = vsub.s32 %v3333_v19, %v4066_v5  ;;  %v3347_v18 = vadd.s32 4294967248, %v4892_v20  ;;  %v3323_v21 = vrot.slane %v3218_v13, %v3322_v24 }
 0x18f   : > { %v3208_v11 = vrot.slane %v3194_v23, %v4097_v42  ;;  %v3343_v60 = vsub.s32 %v3340_v35, %v4066_v5  ;;  %v3311_v58 = vrot.slane %v3212_v25, %v3310_v52  ;;  %v3330_v61 = vrot.slane %v3221_v16, %v3329_v17 }
 0x190   : > { %v3354_v22 = vadd.s32 4294967240, %v4892_v20  ;;  %v3337_v40 = vrot.slane %v4865_v1, %v3336_v54  ;;  %v3350_v14 = vsub.s32 %v3347_v18, %v4066_v5  ;;  %v3361_v38 = vadd.s32 4294967232, %v4892_v20 }
 0x191   : > { %v3209_v59 = vcombine.low %v3201_v10, %v3208_v11  ;;  %v3318_v33 = vsel %vm3317_vm1, %v3316_v15, %v3311_v58  ;;  %v3344_v7 = vrot.slane %v4867_v30, %v3343_v60  ;;  %v3375_v30 = vadd.s32 4294967216, %v4892_v20 }
 0x192   : > { %v4869_v41 = vpop.permute.xlu1 %3229  ;;  %v3325_v34 = vsel %vm3324_vm2, %v3323_v21, %v3318_v33  ;;  %v3357_v0 = vsub.s32 %v3354_v22, %v4066_v5 }
 0x193   : > { %3304 = vperm.xlu0 %3678, %v3209_v59   ;;  %v3332_v8 = vsel %vm3331_vm3, %v3330_v61, %v3325_v34  ;;  %v3368_v59 = vadd.s32 4294967224, %v4892_v20  ;;  %v3351_v1 = vrot.slane %v4869_v41, %v3350_v14 }
 0x194   : > { %v3339_v16 = vsel %vm3338_vm4, %v3337_v40, %v3332_v8 }
 0x195   : > { %v3346_v25 = vsel %vm3345_vm5, %v3344_v7, %v3339_v16  ;;  %v3371_v41 = vsub.s32 %v3368_v59, %v4066_v5 }
 0x196   : > { %v4871_v50 = vpop.permute.xlu1 %3232  ;;  %v3353_v19 = vsel %vm3352_vm6, %v3351_v1, %v3346_v25 }
 0x19a   : > { %v4873_v27 = vpop.permute.xlu1 %3235 }
 0x19e   : > { %v3260_v53 = vpop.permute.xlu1 %3259 }
 0x19f   : > { %v3420_v56 = vrot.slane %v3260_v53, %v3310_v52  ;;  %v3364_v53 = vsub.s32 %v3361_v38, %v4066_v5 }
 0x1a1   : > { %v4875_v28 = vpop.permute.xlu0 %3238  ;;  %v3365_v35 = vrot.slane %v4873_v27, %v3364_v53 }
 0x1a2   : > { %v3372_v18 = vrot.slane %v4875_v28, %v3371_v41 }
 0x1a9   : > { %v3266_v2 = vpop.permute.xlu1 %3265 }
 0x1aa   : > { %v3429_v62 = vrot.slane %v3266_v2, %v3322_v24  ;;  %v3358_v2 = vrot.slane %v4871_v50, %v3357_v0  ;;  %v3378_v24 = vsub.s32 %v3375_v30, %v4066_v5  ;;  %v3403_v50 = vadd.s32 4294967184, %v4892_v20 }
 0x1ad   : > { %v3263_v3 = vpop.permute.xlu0 %3262 }
 0x1ae   : > { %v3424_v9 = vrot.slane %v3263_v3, %v3315_v51  ;;  %v3382_v3 = vadd.s32 4294967208, %v4892_v20  ;;  %v3396_v51 = vadd.s32 4294967192, %v4892_v20 }
 0x1b0   : > { %v3425_v32 = vsel %vm3317_vm1, %v3424_v9, %v3420_v56  ;;  %v3385_v52 = vsub.s32 %v3382_v3, %v4066_v5  ;;  %v3360_v9 = vsel %vm3359_vm7, %v3358_v2, %v3353_v19  ;;  %v3399_v27 = vsub.s32 %v3396_v51, %v4066_v5 }
 0x1b1   : > { %v3430_v10 = vsel %vm3324_vm2, %v3429_v62, %v3425_v32  ;;  %v3367_v61 = vsel %vm3366_vm8, %v3365_v35, %v3360_v9 }
 0x1b4   : > { %v4877_v63 = vpop.permute.xlu1 %3271 }
 0x1b5   : > { %v3439_v23 = vrot.slane %v4877_v63, %v3336_v54 }
 0x1b9   : > { %v3269_v31 = vpop.permute.xlu0 %3268 }
 0x1ba   : > { %v3434_v12 = vrot.slane %v3269_v31, %v3329_v17  ;;  %v3410_v17 = vadd.s32 4294967176, %v4892_v20 }
 0x1bc   : > { %v3435_v4 = vsel %vm3331_vm3, %v3434_v12, %v3430_v10  ;;  %v3413_v62 = vsub.s32 %v3410_v17, %v4066_v5  ;;  %v3374_v12 = vsel %vm3373_vm9, %v3372_v18, %v3367_v61 }
 0x1bd   : > { %v3440_v63 = vsel %vm3338_vm4, %v3439_v23, %v3435_v4 }
 0x1be   : > { %v4881_v37 = vpop.permute.xlu1 %3277 }
 0x1bf   : > { %v3449_v31 = vrot.slane %v4881_v37, %v3350_v14 }
 0x1c3   : > { %v4879_v36 = vpop.permute.xlu0 %3274 }
 0x1c4   : > { %v3444_v13 = vrot.slane %v4879_v36, %v3343_v60  ;;  %v3389_v36 = vadd.s32 4294967200, %v4892_v20 }
 0x1c6   : > { %v3445_v46 = vsel %vm3345_vm5, %v3444_v13, %v3440_v63  ;;  %v3392_v54 = vsub.s32 %v3389_v36, %v4066_v5 }
 0x1c7   : > { %v3450_v15 = vsel %vm3352_vm6, %v3449_v31, %v3445_v46 }
 0x1c8   : > { %v4885_v44 = vpop.permute.xlu1 %3283 }
 0x1ce   : > { %v4883_v39 = vpop.permute.xlu0 %3280 }
 0x1cf   : > { %v3454_v47 = vrot.slane %v4883_v39, %v3357_v0  ;;  %v3459_v39 = vrot.slane %v4885_v44, %v3364_v53  ;;  %v3406_v44 = vsub.s32 %v3403_v50, %v4066_v5 }
 0x1d1   : > { %v3455_v21 = vsel %vm3359_vm7, %v3454_v47, %v3450_v15 }
 0x1d3   : > { %v4887_v43 = vpop.permute.xlu0 %3286 }
 0x1d4   : > { %v3464_v60 = vrot.slane %v4887_v43, %v3371_v41  ;;  %v3460_v43 = vsel %vm3366_vm8, %v3459_v39, %v3455_v21 }
 0x1d6   : > { %v3465_v33 = vsel %vm3373_vm9, %v3464_v60, %v3460_v43 }
 0x1d8   : > { %v4889_v45 = vpop.permute.xlu1 %3241 }
 0x1d9   : > { %v3379_v56 = vrot.slane %v4889_v45, %v3378_v24 }
 0x1dd   : > { %v4895_v26 = vpop.permute.xlu0 %3289 }
 0x1de   : > { %v3469_v20 = vrot.slane %v4895_v26, %v3378_v24 }
 0x1e0   : > { %v3470_v5 = vsel %vm3380_vm10, %v3469_v20, %v3465_v33 }
 0x1e3   : > { %v4899_v48 = vpop.permute.xlu1 %3244 }
 0x1e4   : > { %v3386_v22 = vrot.slane %v4899_v48, %v3385_v52 }
 0x1e8   : > { %v4908_v29 = vpop.permute.xlu0 %3292 }
 0x1e9   : > { %v3474_v28 = vrot.slane %v4908_v29, %v3385_v52  ;;  %v3381_v29 = vsel %vm3380_vm10, %v3379_v56, %v3374_v12 }
 0x1eb   : > { %v3475_v7 = vsel %vm3387_vm11, %v3474_v28, %v3470_v5 }
 0x1ed   : > { %v4912_v49 = vpop.permute.xlu1 %3247 }
 0x1ee   : > { %v3393_v32 = vrot.slane %v4912_v49, %v3392_v54  ;;  %v3388_v49 = vsel %vm3387_vm11, %v3386_v22, %v3381_v29 }
 0x1f0   : > { %v3395_v38 = vsel %vm3394_vm12, %v3393_v32, %v3388_v49 }
 0x1f2   : > { %v4920_v6 = vpop.permute.xlu0 %3295 }
 0x1f3   : > { %v3479_v45 = vrot.slane %v4920_v6, %v3392_v54 }
 0x1f5   : > { %v3480_v8 = vsel %vm3394_vm12, %v3479_v45, %v3475_v7 }
 0x1f8   : > { %v4929_v11 = vpop.permute.xlu1 %3250 }
 0x1f9   : > { %v3400_v48 = vrot.slane %v4929_v11, %v3399_v27 }
 0x1fb   : > { %v3402_v23 = vsel %vm3401_vm13, %v3400_v48, %v3395_v38 }
 0x1fd   : > { %v3299_v55 = vpop.permute.xlu0 %3298 }
 0x1fe   : > { %v3484_v40 = vrot.slane %v3299_v55, %v3399_v27 }
 0x200   : > { %v3485_v10 = vsel %vm3401_vm13, %v3484_v40, %v3480_v8 }
 0x202   : > { %v3254_v37 = vpop.permute.xlu1 %3253 }
 0x203   : > { %v3407_v14 = vrot.slane %v3254_v37, %v3406_v44 }
 0x205   : > { %v3409_v59 = vsel %vm3408_vm14, %v3407_v14, %v3402_v23 }
 0x207   : > { %v3302_v58 = vpop.permute.xlu0 %3301 }
 0x208   : > { %v3489_v34 = vrot.slane %v3302_v58, %v3406_v44 }
 0x20a   : > { %v3490_v4 = vsel %vm3408_vm14, %v3489_v34, %v3485_v10 }
 0x20d   : > { %v3257_v26 = vpop.permute.xlu1 %3256 }
 0x20e   : > { %v3414_v6 = vrot.slane %v3257_v26, %v3413_v62 }
 0x210   : > { %v3416_v13 = vsel %vm3415_vm15, %v3414_v6, %v3409_v59 }
 0x212   : > { %v3305_v0 = vpop.permute.xlu0 %3304 }
 0x213   : > { %v3494_v11 = vrot.slane %v3305_v0, %v3413_v62 }
 0x215   : > { %v3495_v16 = vsel %vm3415_vm15, %v3494_v11, %v3490_v4 }
 0x216   : > { %v3496_v1 = vcombine.low %v3416_v13, %v3495_v16 }
 0x218   : > { %v3503_v30 = vrot.slane %v3496_v1, %v4097_v42 }
 0x21a   : > { %v3510_v25 = vrot.slane %v3503_v30, %v4097_v42 }
 0x21c   : > { %3516 = vst.msk [vmem:[%s177_s9] sm:$0x3] %vm3514_vm0, %v3510_v25 }
 0x21d   : > { %3821 = shalt.err (!%p3818_p3)
}
 0x21e   : > { %s3822_s25 = scalar_lea.hbm %s4993_s13, 32  ;;  %s3826_s29 = scalar_lea.hbm %s5040_s3, 64 }
 0x21f   : > { %p3823_p4 = scmp.ne.s32.totalorder %s4993_s13, %s3822_s25  ;;  %p3827_p9 = scmp.lt.u32.totalorder %s4993_s13, %s5040_s3 }
 0x220   : > { %p3828_p10 = scmp.lt.u32.totalorder %s3826_s29, %s3822_s25  ;;  %p3830_p12 = scmp.lt.u32.totalorder %s3822_s25, %s4993_s13 }
 0x221   : > { %p3824_p7 = pnand %p3823_p4, %p3933_p5 }
 0x222   : > { %p3829_p11 = por %p3828_p10, %p3827_p9 }
 0x223   : > { %p3825_p8 = pneg %p3824_p7 }
 0x224   : > { %p3831_p13 = por %p3830_p12, %p3829_p11 }
 0x226   : > { %p3832_p0 = pnand %p3831_p13, %p3825_p8 }
 0x228   : > { %3835 = shalt.err (!%p3832_p0)
}
 0x229   : > { %3637 = dma.vmem_to_hbm [thread:$0]  (%p3933_p5), %s4995_s10, 32, %s4993_s13, %s3518_s2  }
 0x22a PF: > { %p3643_p1 = scmp.ge.s32.totalorder %s3870_s17, 2  ;;  %s3544_s5 = sand.u32 1, %s3858_s14  }
 0x22b   : > { %s3545_s6 = scalar_lea.sflag [#allocation4], %s3544_s5 }
 0x22c   : > { %p3640_p2 = pnand %p3643_p1, %p3937_p6 }
 0x22e   : > { %3853 = dma.done.wait (!%p3640_p2), %s3545_s6, 32  }
 0x22f   : > { %3855 = vsyncadd (!%p3640_p2), %s3545_s6, 4294967264  ;;  %p14_p3 = scmp.ge.s32.totalorder %s3921_s19, 4   ;;  %s5043_s14 = smov %s3862_s15 }
 0x230   : > { %s5044_s15 = smov %s3866_s16  ;;  %s5045_s16 = smov %s3931_s22 }
 0x231   : > { %s5046_s17 = smov %s3921_s19  ;;  %16 = sbr.rel (!%p14_p3) target bundleno = 5 (0x5), region = 67 }
 0x238   :  { %3550 = vsyncpa [#allocation4], 1 }
 0x239   :  { %3552 = vsyncpa [#allocation4 + $0x1], 1 }

</bundles_post_ra>
